<compile_context>
chip_gen: v6e
topology: v6e:2x2x1
jax: 0.10.0
libtpu: 0.0.40
codegen_flags: <defaults>
</compile_context>

<pallas_src>
import math

import jax
import jax.numpy as jnp
from jax.experimental import pallas as pl
from jax.experimental.pallas import tpu as pltpu

# ----------------------- small, module-consistent config ---------------------
B, S = 2, 8                 # batch, sequence length
HIDDEN = 32                 # hidden size (768 in ChemBERTa)
N_HEADS = 4
HEAD_DIM = HIDDEN // N_HEADS
N_LAYERS = 2                # 12 in ChemBERTa
INTERMEDIATE = 64           # 3072 in ChemBERTa
VOCAB = 64                  # stands in for the 767-entry ChemBERTa vocab
OUT_DIM = 16                # stands in for fps_len (output_dim)
MAX_POS = 16
LN_EPS = 1e-5


# ------------------------------ shared helpers --------------------------------
def _ln(x, g, b):
    # LayerNorm over the last dim, f32 math.
    mu = jnp.mean(x, axis=-1, keepdims=True)
    var = jnp.mean((x - mu) ** 2, axis=-1, keepdims=True)
    return (x - mu) * jax.lax.rsqrt(var + LN_EPS) * g + b


def _bf16_dot(a, w_ref, b_ref):
    # y = a_bf16 @ W_bf16 + b_f32, accumulated in f32 on the MXU.
    y = jnp.dot(a.astype(jnp.bfloat16), w_ref[...],
                preferred_element_type=jnp.float32)
    return y + b_ref[...]


# ------------------------------ fused forward kernel --------------------------
def _forward_kernel(
    emb_ref, mask_ref, embg_ref, embb_ref,
    wqkv_ref, bqkv_ref, wo_ref, bo_ref, ln1g_ref, ln1b_ref,
    w1_ref, b1_ref, w2_ref, b2_ref, ln2g_ref, ln2b_ref,
    lmd_w_ref, lmd_b_ref, lmg_ref, lmb_ref,
    dec_w_ref, dec_b_ref, wout_ref, bout_ref,
    o_ref,
    act_ref,
):
    # grid = (batch, layer); one batch element per outer step, one encoder layer
    # per inner step; act_ref carries the (S, H) activation across layer steps.
    l = pl.program_id(1)

    # ---- embedding LayerNorm, once per batch element (start of layer sweep) ----
    @pl.when(l == 0)
    def _():
        act_ref[...] = _ln(emb_ref[...].astype(jnp.float32),
                           embg_ref[...], embb_ref[...])

    x = act_ref[...]                                     # (S, H) f32 residual
    mask = mask_ref[...].astype(jnp.float32)             # (1, S), 1 = keep, 0 = pad
    bias = (1.0 - mask) * (-1e9)                         # additive key mask

    # ---- fused QKV projection, kept as a register value (no VMEM scratch) -----
    qkv = _bf16_dot(x, wqkv_ref, bqkv_ref)               # (S, 3H) f32

    # ---- multi-head self-attention; heads are value slices, outputs concat ----
    scale = 1.0 / math.sqrt(HEAD_DIM)
    ctx_parts = []
    for h in range(N_HEADS):
        lo = h * HEAD_DIM
        qh = qkv[:, lo:lo + HEAD_DIM].astype(jnp.bfloat16)                      # (S, d)
        kh = qkv[:, HIDDEN + lo:HIDDEN + lo + HEAD_DIM].astype(jnp.bfloat16)
        vh = qkv[:, 2 * HIDDEN + lo:2 * HIDDEN + lo + HEAD_DIM].astype(jnp.bfloat16)
        # scores = q @ k^T (contract last dims; no explicit transpose)
        s = jax.lax.dot_general(
            qh, kh, (((1,), (1,)), ((), ())),
            preferred_element_type=jnp.float32) * scale + bias                  # (S, S)
        s = s - jnp.max(s, axis=-1, keepdims=True)
        p = jnp.exp(s)
        p = p * pl.reciprocal(jnp.sum(p, axis=-1, keepdims=True), approx=True)
        ctx_parts.append(jnp.dot(p.astype(jnp.bfloat16), vh,
                                 preferred_element_type=jnp.float32))           # (S, d)
    ctx = jnp.concatenate(ctx_parts, axis=-1)            # (S, H) value, no scratch

    # ---- output projection + residual + LayerNorm -----------------------------
    attn = _bf16_dot(ctx, wo_ref, bo_ref)                # (S, H)
    x1 = _ln(attn + x, ln1g_ref[...], ln1b_ref[...])

    # ---- fused FFN: w1 + GELU + w2 + residual + LayerNorm ---------------------
    h1 = jax.nn.gelu(_bf16_dot(x1, w1_ref, b1_ref), approximate=True)           # (S, I)
    h2 = _bf16_dot(h1, w2_ref, b2_ref)                                          # (S, H)
    y = _ln(h2 + x1, ln2g_ref[...], ln2b_ref[...])
    act_ref[...] = y                                     # carry to next layer step

    # ---- after the last layer: CLS row -> LM head -> final linear -------------
    @pl.when(l == pl.num_programs(1) - 1)
    def _():
        cls = y[0:1, :]                                                          # (1, H)
        hh = jax.nn.gelu(_bf16_dot(cls, lmd_w_ref, lmd_b_ref), approximate=True)
        hh = _ln(hh, lmg_ref[...], lmb_ref[...])
        logits = _bf16_dot(hh, dec_w_ref, dec_b_ref)                             # (1, VOCAB)
        # nn.Dropout(0.5) is identity at inference
        o_ref[...] = _bf16_dot(logits, wout_ref, bout_ref).astype(o_ref.dtype)   # (1, OUT)


# ------------------------------ wrapper ----------------------------------------
def chembert_encoder_forward(params, input_ids, attention_mask):
    Bsz, Slen = input_ids.shape

    # embeddings (gather + broadcast add = XLA glue); their LN is inside the kernel
    tok = jnp.take(params["word_emb"], input_ids, axis=0)            # (B, S, H)
    pos = params["pos_emb"][:Slen][None, :, :]                       # (1, S, H)
    typ = params["type_emb"][0][None, None, :]                       # (1, 1, H)
    emb = tok + pos + typ                                            # (B, S, H) f32
    mask3 = attention_mask.astype(jnp.float32).reshape(Bsz, 1, Slen)

    L = params["wqkv"].shape[0]

    def rep2(a):
        # grid-invariant 2D weight/bias (resident; re-fetch skipped by pipeline)
        return pl.BlockSpec(a.shape, lambda b, l: (0, 0))

    def per_layer(a):
        # stacked (L, r, c) weights: stream layer l's (r, c) slice
        return pl.BlockSpec((None,) + a.shape[1:], lambda b, l: (l, 0, 0))

    out = pl.pallas_call(
        _forward_kernel,
        out_shape=jax.ShapeDtypeStruct((Bsz, 1, OUT_DIM), jnp.float32),
        grid=(Bsz, L),
        in_specs=[
            pl.BlockSpec((None, Slen, HIDDEN), lambda b, l: (b, 0, 0)),   # emb
            pl.BlockSpec((None, 1, Slen), lambda b, l: (b, 0, 0)),        # mask
            rep2(params["emb_ln_g"]), rep2(params["emb_ln_b"]),
            per_layer(params["wqkv"]), per_layer(params["bqkv"]),
            per_layer(params["wo"]), per_layer(params["bo"]),
            per_layer(params["ln1_g"]), per_layer(params["ln1_b"]),
            per_layer(params["w1"]), per_layer(params["b1"]),
            per_layer(params["w2"]), per_layer(params["b2"]),
            per_layer(params["ln2_g"]), per_layer(params["ln2_b"]),
            rep2(params["lm_dense_w"]), rep2(params["lm_dense_b"]),
            rep2(params["lm_ln_g"]), rep2(params["lm_ln_b"]),
            rep2(params["lm_dec_w"]), rep2(params["lm_dec_b"]),
            rep2(params["w_out"]), rep2(params["b_out"]),
        ],
        out_specs=pl.BlockSpec((None, 1, OUT_DIM), lambda b, l: (b, 0, 0)),
        scratch_shapes=[pltpu.VMEM((Slen, HIDDEN), jnp.float32)],   # activation carry
        compiler_params=pltpu.CompilerParams(
            dimension_semantics=("parallel", "arbitrary")),
    )(emb, mask3,
      params["emb_ln_g"], params["emb_ln_b"],
      params["wqkv"], params["bqkv"], params["wo"], params["bo"],
      params["ln1_g"], params["ln1_b"],
      params["w1"], params["b1"], params["w2"], params["b2"],
      params["ln2_g"], params["ln2_b"],
      params["lm_dense_w"], params["lm_dense_b"],
      params["lm_ln_g"], params["lm_ln_b"],
      params["lm_dec_w"], params["lm_dec_b"],
      params["w_out"], params["b_out"])

    return out[:, 0, :]                                               # (B, OUT_DIM)


# ------------------------------ parameter init --------------------------------
def init_params(key):
    keys = iter(jax.random.split(key, 64))

    def w_init(*shape):
        # matmul operands live in bf16 (f32 accumulation in-kernel)
        return (jax.random.normal(next(keys), shape, jnp.float32) * 0.02
                ).astype(jnp.bfloat16)

    def zeros(*shape):
        return jnp.zeros(shape, jnp.float32)

    def ones(*shape):
        return jnp.ones(shape, jnp.float32)

    return {
        "word_emb": jax.random.normal(next(keys), (VOCAB, HIDDEN), jnp.float32) * 0.02,
        "pos_emb": jax.random.normal(next(keys), (MAX_POS, HIDDEN), jnp.float32) * 0.02,
        "type_emb": jax.random.normal(next(keys), (1, HIDDEN), jnp.float32) * 0.02,
        "emb_ln_g": ones(1, HIDDEN), "emb_ln_b": zeros(1, HIDDEN),
        # per-layer encoder weights stacked along a leading layer axis
        "wqkv": w_init(N_LAYERS, HIDDEN, 3 * HIDDEN),        # fused [Wq|Wk|Wv]
        "bqkv": zeros(N_LAYERS, 1, 3 * HIDDEN),
        "wo": w_init(N_LAYERS, HIDDEN, HIDDEN),
        "bo": zeros(N_LAYERS, 1, HIDDEN),
        "ln1_g": ones(N_LAYERS, 1, HIDDEN), "ln1_b": zeros(N_LAYERS, 1, HIDDEN),
        "w1": w_init(N_LAYERS, HIDDEN, INTERMEDIATE),
        "b1": zeros(N_LAYERS, 1, INTERMEDIATE),
        "w2": w_init(N_LAYERS, INTERMEDIATE, HIDDEN),
        "b2": zeros(N_LAYERS, 1, HIDDEN),
        "ln2_g": ones(N_LAYERS, 1, HIDDEN), "ln2_b": zeros(N_LAYERS, 1, HIDDEN),
        # RoBERTa LM head: dense -> gelu -> LN -> decoder(vocab)
        "lm_dense_w": w_init(HIDDEN, HIDDEN), "lm_dense_b": zeros(1, HIDDEN),
        "lm_ln_g": ones(1, HIDDEN), "lm_ln_b": zeros(1, HIDDEN),
        "lm_dec_w": w_init(HIDDEN, VOCAB), "lm_dec_b": zeros(1, VOCAB),
        # final projection  self.w = nn.Linear(vocab, output_dim)
        "w_out": w_init(VOCAB, OUT_DIM), "b_out": zeros(1, OUT_DIM),
    }


# ----------------------------------- main --------------------------------------
if __name__ == "__main__":
    key = jax.random.PRNGKey(0)
    k_params, k_ids = jax.random.split(key)
    params = init_params(k_params)

    input_ids = jax.random.randint(k_ids, (B, S), 0, VOCAB, dtype=jnp.int32)
    attention_mask = jnp.ones((B, S), dtype=jnp.int32)

    forward = jax.jit(chembert_encoder_forward)
    out = forward(params, input_ids, attention_mask)
    out = jax.block_until_ready(out)
    assert out.shape == (B, OUT_DIM) and out.dtype == jnp.float32
    print("KERNEL_OK")
</pallas_src>

<mosaic_0001>
module attributes {stable_mosaic.version = 11 : i64} {
  func.func @_forward_kernel(%arg0: i32, %arg1: i32, %arg2: memref<1x8x32xf32, #tpu.memory_space<vmem>>, %arg3: memref<1x1x8xf32, #tpu.memory_space<vmem>>, %arg4: memref<1x32xf32, #tpu.memory_space<vmem>>, %arg5: memref<1x32xf32, #tpu.memory_space<vmem>>, %arg6: memref<1x32x96xbf16, #tpu.memory_space<vmem>>, %arg7: memref<1x1x96xf32, #tpu.memory_space<vmem>>, %arg8: memref<1x32x32xbf16, #tpu.memory_space<vmem>>, %arg9: memref<1x1x32xf32, #tpu.memory_space<vmem>>, %arg10: memref<1x1x32xf32, #tpu.memory_space<vmem>>, %arg11: memref<1x1x32xf32, #tpu.memory_space<vmem>>, %arg12: memref<1x32x64xbf16, #tpu.memory_space<vmem>>, %arg13: memref<1x1x64xf32, #tpu.memory_space<vmem>>, %arg14: memref<1x64x32xbf16, #tpu.memory_space<vmem>>, %arg15: memref<1x1x32xf32, #tpu.memory_space<vmem>>, %arg16: memref<1x1x32xf32, #tpu.memory_space<vmem>>, %arg17: memref<1x1x32xf32, #tpu.memory_space<vmem>>, %arg18: memref<32x32xbf16, #tpu.memory_space<vmem>>, %arg19: memref<1x32xf32, #tpu.memory_space<vmem>>, %arg20: memref<1x32xf32, #tpu.memory_space<vmem>>, %arg21: memref<1x32xf32, #tpu.memory_space<vmem>>, %arg22: memref<32x64xbf16, #tpu.memory_space<vmem>>, %arg23: memref<1x64xf32, #tpu.memory_space<vmem>>, %arg24: memref<64x16xbf16, #tpu.memory_space<vmem>>, %arg25: memref<1x16xf32, #tpu.memory_space<vmem>>, %arg26: memref<1x1x16xf32, #tpu.memory_space<vmem>>, %arg27: memref<8x32xf32, #tpu.memory_space<vmem>>) attributes {dimension_semantics = [#tpu.dimension_semantics<parallel>, #tpu.dimension_semantics<arbitrary>], iteration_bounds = array<i64: 2, 2>, scalar_prefetch = 0 : i64, scratch_operands = 1 : i64, tpu.core_type = #tpu.core_type<tc>, window_params = [{transform_indices = @transform_0, window_bounds = array<i64: 1, 8, 32>}, {transform_indices = @transform_1, window_bounds = array<i64: 1, 1, 8>}, {pipeline_mode = #tpu.pipeline_mode<synchronous>, transform_indices = @transform_2, window_bounds = array<i64: 1, 32>}, {pipeline_mode = #tpu.pipeline_mode<synchronous>, transform_indices = @transform_3, window_bounds = array<i64: 1, 32>}, {transform_indices = @transform_4, window_bounds = array<i64: 1, 32, 96>}, {transform_indices = @transform_5, window_bounds = array<i64: 1, 1, 96>}, {transform_indices = @transform_6, window_bounds = array<i64: 1, 32, 32>}, {transform_indices = @transform_7, window_bounds = array<i64: 1, 1, 32>}, {transform_indices = @transform_8, window_bounds = array<i64: 1, 1, 32>}, {transform_indices = @transform_9, window_bounds = array<i64: 1, 1, 32>}, {transform_indices = @transform_10, window_bounds = array<i64: 1, 32, 64>}, {transform_indices = @transform_11, window_bounds = array<i64: 1, 1, 64>}, {transform_indices = @transform_12, window_bounds = array<i64: 1, 64, 32>}, {transform_indices = @transform_13, window_bounds = array<i64: 1, 1, 32>}, {transform_indices = @transform_14, window_bounds = array<i64: 1, 1, 32>}, {transform_indices = @transform_15, window_bounds = array<i64: 1, 1, 32>}, {pipeline_mode = #tpu.pipeline_mode<synchronous>, transform_indices = @transform_16, window_bounds = array<i64: 32, 32>}, {pipeline_mode = #tpu.pipeline_mode<synchronous>, transform_indices = @transform_17, window_bounds = array<i64: 1, 32>}, {pipeline_mode = #tpu.pipeline_mode<synchronous>, transform_indices = @transform_18, window_bounds = array<i64: 1, 32>}, {pipeline_mode = #tpu.pipeline_mode<synchronous>, transform_indices = @transform_19, window_bounds = array<i64: 1, 32>}, {pipeline_mode = #tpu.pipeline_mode<synchronous>, transform_indices = @transform_20, window_bounds = array<i64: 32, 64>}, {pipeline_mode = #tpu.pipeline_mode<synchronous>, transform_indices = @transform_21, window_bounds = array<i64: 1, 64>}, {pipeline_mode = #tpu.pipeline_mode<synchronous>, transform_indices = @transform_22, window_bounds = array<i64: 64, 16>}, {pipeline_mode = #tpu.pipeline_mode<synchronous>, transform_indices = @transform_23, window_bounds = array<i64: 1, 16>}, {transform_indices = @transform_24, window_bounds = array<i64: 1, 1, 16>}]} {
    %c0_i32 = arith.constant 0 : i32
    %0 = arith.cmpi eq, %arg1, %c0_i32 : i32
    %1 = arith.extui %0 : i1 to i32
    %c0_i32_0 = arith.constant 0 : i32
    %2 = arith.cmpi ne, %1, %c0_i32_0 : i32
    scf.if %2 {
      %c0_83 = arith.constant 0 : index
      %c0_84 = arith.constant 0 : index
      %c0_85 = arith.constant 0 : index
      %206 = vector.load %arg2[%c0_83, %c0_84, %c0_85] : memref<1x8x32xf32, #tpu.memory_space<vmem>>, vector<1x8x32xf32>
      %207 = vector.shape_cast %206 : vector<1x8x32xf32> to vector<8x32xf32>
      %c0_86 = arith.constant 0 : index
      %c0_87 = arith.constant 0 : index
      %208 = vector.load %arg4[%c0_86, %c0_87] : memref<1x32xf32, #tpu.memory_space<vmem>>, vector<1x32xf32>
      %c0_88 = arith.constant 0 : index
      %c0_89 = arith.constant 0 : index
      %209 = vector.load %arg5[%c0_88, %c0_89] : memref<1x32xf32, #tpu.memory_space<vmem>>, vector<1x32xf32>
      %cst_90 = arith.constant dense<0.000000e+00> : vector<8xf32>
      %210 = vector.multi_reduction <add>, %207, %cst_90 [1] : vector<8x32xf32> to vector<8xf32>
      %211 = vector.shape_cast %210 : vector<8xf32> to vector<8x1xf32>
      %cst_91 = arith.constant 3.200000e+01 : f32
      %212 = vector.broadcast %cst_91 : f32 to vector<8x1xf32>
      %213 = arith.divf %211, %212 : vector<8x1xf32>
      %214 = vector.broadcast %213 : vector<8x1xf32> to vector<8x32xf32>
      %215 = arith.subf %207, %214 : vector<8x32xf32>
      %216 = arith.mulf %215, %215 : vector<8x32xf32>
      %cst_92 = arith.constant dense<0.000000e+00> : vector<8xf32>
      %217 = vector.multi_reduction <add>, %216, %cst_92 [1] : vector<8x32xf32> to vector<8xf32>
      %218 = vector.shape_cast %217 : vector<8xf32> to vector<8x1xf32>
      %cst_93 = arith.constant 3.200000e+01 : f32
      %219 = vector.broadcast %cst_93 : f32 to vector<8x1xf32>
      %220 = arith.divf %218, %219 : vector<8x1xf32>
      %221 = vector.broadcast %213 : vector<8x1xf32> to vector<8x32xf32>
      %222 = arith.subf %207, %221 : vector<8x32xf32>
      %cst_94 = arith.constant 9.99999974E-6 : f32
      %223 = vector.broadcast %cst_94 : f32 to vector<8x1xf32>
      %224 = arith.addf %220, %223 : vector<8x1xf32>
      %225 = math.rsqrt %224 : vector<8x1xf32>
      %226 = vector.broadcast %225 : vector<8x1xf32> to vector<8x32xf32>
      %227 = arith.mulf %222, %226 : vector<8x32xf32>
      %228 = vector.broadcast %208 : vector<1x32xf32> to vector<8x32xf32>
      %229 = arith.mulf %227, %228 : vector<8x32xf32>
      %230 = vector.broadcast %209 : vector<1x32xf32> to vector<8x32xf32>
      %231 = arith.addf %229, %230 : vector<8x32xf32>
      %c0_95 = arith.constant 0 : index
      %c0_96 = arith.constant 0 : index
      %232 = vector.load %arg27[%c0_95, %c0_96] : memref<8x32xf32, #tpu.memory_space<vmem>>, vector<8x32xf32>
      tpu.vector_store %arg27[%c0_95, %c0_96], %231 {strides = array<i32>} : memref<8x32xf32, #tpu.memory_space<vmem>>, vector<8x32xf32>,
    } else {
    }
    %c0 = arith.constant 0 : index
    %c0_1 = arith.constant 0 : index
    %3 = vector.load %arg27[%c0, %c0_1] : memref<8x32xf32, #tpu.memory_space<vmem>>, vector<8x32xf32>
    %c0_2 = arith.constant 0 : index
    %c0_3 = arith.constant 0 : index
    %c0_4 = arith.constant 0 : index
    %4 = vector.load %arg3[%c0_2, %c0_3, %c0_4] : memref<1x1x8xf32, #tpu.memory_space<vmem>>, vector<1x1x8xf32>
    %5 = vector.shape_cast %4 : vector<1x1x8xf32> to vector<1x8xf32>
    %cst = arith.constant 1.000000e+00 : f32
    %6 = vector.broadcast %cst : f32 to vector<1x8xf32>
    %7 = arith.subf %6, %5 : vector<1x8xf32>
    %cst_5 = arith.constant -1.000000e+09 : f32
    %8 = vector.broadcast %cst_5 : f32 to vector<1x8xf32>
    %9 = arith.mulf %7, %8 : vector<1x8xf32>
    %10 = arith.truncf %3 : vector<8x32xf32> to vector<8x32xbf16>
    %c0_6 = arith.constant 0 : index
    %c0_7 = arith.constant 0 : index
    %c0_8 = arith.constant 0 : index
    %11 = vector.load %arg6[%c0_6, %c0_7, %c0_8] : memref<1x32x96xbf16, #tpu.memory_space<vmem>>, vector<1x32x96xbf16>
    %12 = vector.shape_cast %11 : vector<1x32x96xbf16> to vector<32x96xbf16>
    %cst_9 = arith.constant dense<0.000000e+00> : vector<8x96xf32>
    %13 = tpu.matmul %10, %12, %cst_9 {dimension_numbers = #tpu.dot_dimension_numbers<[1], [0], [0], [1], [0, 0, 1, 1], [], []>} : vector<8x32xbf16>, vector<32x96xbf16>, vector<8x96xf32> -> vector<8x96xf32>
    %c0_10 = arith.constant 0 : index
    %c0_11 = arith.constant 0 : index
    %c0_12 = arith.constant 0 : index
    %14 = vector.load %arg7[%c0_10, %c0_11, %c0_12] : memref<1x1x96xf32, #tpu.memory_space<vmem>>, vector<1x1x96xf32>
    %15 = vector.shape_cast %14 : vector<1x1x96xf32> to vector<1x96xf32>
    %16 = vector.broadcast %15 : vector<1x96xf32> to vector<8x96xf32>
    %17 = arith.addf %13, %16 : vector<8x96xf32>
    %18 = vector.extract_strided_slice %17 {offsets = [0, 0], sizes = [8, 8], strides = [1, 1]} : vector<8x96xf32> to vector<8x8xf32>
    %19 = arith.truncf %18 : vector<8x8xf32> to vector<8x8xbf16>
    %20 = vector.extract_strided_slice %17 {offsets = [0, 32], sizes = [8, 8], strides = [1, 1]} : vector<8x96xf32> to vector<8x8xf32>
    %21 = arith.truncf %20 : vector<8x8xf32> to vector<8x8xbf16>
    %22 = vector.extract_strided_slice %17 {offsets = [0, 64], sizes = [8, 8], strides = [1, 1]} : vector<8x96xf32> to vector<8x8xf32>
    %23 = arith.truncf %22 : vector<8x8xf32> to vector<8x8xbf16>
    %cst_13 = arith.constant dense<0.000000e+00> : vector<8x8xf32>
    %24 = tpu.matmul %19, %21, %cst_13 {dimension_numbers = #tpu.dot_dimension_numbers<[1], [1], [0], [0], [0, 0, 1, 0], [], []>} : vector<8x8xbf16>, vector<8x8xbf16>, vector<8x8xf32> -> vector<8x8xf32>
    %cst_14 = arith.constant 0.353553385 : f32
    %25 = vector.broadcast %cst_14 : f32 to vector<8x8xf32>
    %26 = arith.mulf %24, %25 : vector<8x8xf32>
    %27 = vector.broadcast %9 : vector<1x8xf32> to vector<8x8xf32>
    %28 = arith.addf %26, %27 : vector<8x8xf32>
    %cst_15 = arith.constant dense<0xFF800000> : vector<8xf32>
    %29 = vector.multi_reduction <maximumf>, %28, %cst_15 [1] : vector<8x8xf32> to vector<8xf32>
    %30 = vector.shape_cast %29 : vector<8xf32> to vector<8x1xf32>
    %31 = vector.broadcast %30 : vector<8x1xf32> to vector<8x8xf32>
    %32 = arith.subf %28, %31 : vector<8x8xf32>
    %33 = math.exp %32 : vector<8x8xf32>
    %cst_16 = arith.constant dense<0.000000e+00> : vector<8xf32>
    %34 = vector.multi_reduction <add>, %33, %cst_16 [1] : vector<8x8xf32> to vector<8xf32>
    %35 = vector.shape_cast %34 : vector<8xf32> to vector<8x1xf32>
    %36 = tpu.reciprocal %35 {approx = true} : vector<8x1xf32> -> vector<8x1xf32>
    %37 = vector.broadcast %36 : vector<8x1xf32> to vector<8x8xf32>
    %38 = arith.mulf %33, %37 : vector<8x8xf32>
    %39 = arith.truncf %38 : vector<8x8xf32> to vector<8x8xbf16>
    %cst_17 = arith.constant dense<0.000000e+00> : vector<8x8xf32>
    %40 = tpu.matmul %39, %23, %cst_17 {dimension_numbers = #tpu.dot_dimension_numbers<[1], [0], [0], [1], [0, 0, 1, 1], [], []>} : vector<8x8xbf16>, vector<8x8xbf16>, vector<8x8xf32> -> vector<8x8xf32>
    %41 = vector.extract_strided_slice %17 {offsets = [0, 8], sizes = [8, 8], strides = [1, 1]} : vector<8x96xf32> to vector<8x8xf32>
    %42 = arith.truncf %41 : vector<8x8xf32> to vector<8x8xbf16>
    %43 = vector.extract_strided_slice %17 {offsets = [0, 40], sizes = [8, 8], strides = [1, 1]} : vector<8x96xf32> to vector<8x8xf32>
    %44 = arith.truncf %43 : vector<8x8xf32> to vector<8x8xbf16>
    %45 = vector.extract_strided_slice %17 {offsets = [0, 72], sizes = [8, 8], strides = [1, 1]} : vector<8x96xf32> to vector<8x8xf32>
    %46 = arith.truncf %45 : vector<8x8xf32> to vector<8x8xbf16>
    %cst_18 = arith.constant dense<0.000000e+00> : vector<8x8xf32>
    %47 = tpu.matmul %42, %44, %cst_18 {dimension_numbers = #tpu.dot_dimension_numbers<[1], [1], [0], [0], [0, 0, 1, 0], [], []>} : vector<8x8xbf16>, vector<8x8xbf16>, vector<8x8xf32> -> vector<8x8xf32>
    %cst_19 = arith.constant 0.353553385 : f32
    %48 = vector.broadcast %cst_19 : f32 to vector<8x8xf32>
    %49 = arith.mulf %47, %48 : vector<8x8xf32>
    %50 = vector.broadcast %9 : vector<1x8xf32> to vector<8x8xf32>
    %51 = arith.addf %49, %50 : vector<8x8xf32>
    %cst_20 = arith.constant dense<0xFF800000> : vector<8xf32>
    %52 = vector.multi_reduction <maximumf>, %51, %cst_20 [1] : vector<8x8xf32> to vector<8xf32>
    %53 = vector.shape_cast %52 : vector<8xf32> to vector<8x1xf32>
    %54 = vector.broadcast %53 : vector<8x1xf32> to vector<8x8xf32>
    %55 = arith.subf %51, %54 : vector<8x8xf32>
    %56 = math.exp %55 : vector<8x8xf32>
    %cst_21 = arith.constant dense<0.000000e+00> : vector<8xf32>
    %57 = vector.multi_reduction <add>, %56, %cst_21 [1] : vector<8x8xf32> to vector<8xf32>
    %58 = vector.shape_cast %57 : vector<8xf32> to vector<8x1xf32>
    %59 = tpu.reciprocal %58 {approx = true} : vector<8x1xf32> -> vector<8x1xf32>
    %60 = vector.broadcast %59 : vector<8x1xf32> to vector<8x8xf32>
    %61 = arith.mulf %56, %60 : vector<8x8xf32>
    %62 = arith.truncf %61 : vector<8x8xf32> to vector<8x8xbf16>
    %cst_22 = arith.constant dense<0.000000e+00> : vector<8x8xf32>
    %63 = tpu.matmul %62, %46, %cst_22 {dimension_numbers = #tpu.dot_dimension_numbers<[1], [0], [0], [1], [0, 0, 1, 1], [], []>} : vector<8x8xbf16>, vector<8x8xbf16>, vector<8x8xf32> -> vector<8x8xf32>
    %64 = vector.extract_strided_slice %17 {offsets = [0, 16], sizes = [8, 8], strides = [1, 1]} : vector<8x96xf32> to vector<8x8xf32>
    %65 = arith.truncf %64 : vector<8x8xf32> to vector<8x8xbf16>
    %66 = vector.extract_strided_slice %17 {offsets = [0, 48], sizes = [8, 8], strides = [1, 1]} : vector<8x96xf32> to vector<8x8xf32>
    %67 = arith.truncf %66 : vector<8x8xf32> to vector<8x8xbf16>
    %68 = vector.extract_strided_slice %17 {offsets = [0, 80], sizes = [8, 8], strides = [1, 1]} : vector<8x96xf32> to vector<8x8xf32>
    %69 = arith.truncf %68 : vector<8x8xf32> to vector<8x8xbf16>
    %cst_23 = arith.constant dense<0.000000e+00> : vector<8x8xf32>
    %70 = tpu.matmul %65, %67, %cst_23 {dimension_numbers = #tpu.dot_dimension_numbers<[1], [1], [0], [0], [0, 0, 1, 0], [], []>} : vector<8x8xbf16>, vector<8x8xbf16>, vector<8x8xf32> -> vector<8x8xf32>
    %cst_24 = arith.constant 0.353553385 : f32
    %71 = vector.broadcast %cst_24 : f32 to vector<8x8xf32>
    %72 = arith.mulf %70, %71 : vector<8x8xf32>
    %73 = vector.broadcast %9 : vector<1x8xf32> to vector<8x8xf32>
    %74 = arith.addf %72, %73 : vector<8x8xf32>
    %cst_25 = arith.constant dense<0xFF800000> : vector<8xf32>
    %75 = vector.multi_reduction <maximumf>, %74, %cst_25 [1] : vector<8x8xf32> to vector<8xf32>
    %76 = vector.shape_cast %75 : vector<8xf32> to vector<8x1xf32>
    %77 = vector.broadcast %76 : vector<8x1xf32> to vector<8x8xf32>
    %78 = arith.subf %74, %77 : vector<8x8xf32>
    %79 = math.exp %78 : vector<8x8xf32>
    %cst_26 = arith.constant dense<0.000000e+00> : vector<8xf32>
    %80 = vector.multi_reduction <add>, %79, %cst_26 [1] : vector<8x8xf32> to vector<8xf32>
    %81 = vector.shape_cast %80 : vector<8xf32> to vector<8x1xf32>
    %82 = tpu.reciprocal %81 {approx = true} : vector<8x1xf32> -> vector<8x1xf32>
    %83 = vector.broadcast %82 : vector<8x1xf32> to vector<8x8xf32>
    %84 = arith.mulf %79, %83 : vector<8x8xf32>
    %85 = arith.truncf %84 : vector<8x8xf32> to vector<8x8xbf16>
    %cst_27 = arith.constant dense<0.000000e+00> : vector<8x8xf32>
    %86 = tpu.matmul %85, %69, %cst_27 {dimension_numbers = #tpu.dot_dimension_numbers<[1], [0], [0], [1], [0, 0, 1, 1], [], []>} : vector<8x8xbf16>, vector<8x8xbf16>, vector<8x8xf32> -> vector<8x8xf32>
    %87 = vector.extract_strided_slice %17 {offsets = [0, 24], sizes = [8, 8], strides = [1, 1]} : vector<8x96xf32> to vector<8x8xf32>
    %88 = arith.truncf %87 : vector<8x8xf32> to vector<8x8xbf16>
    %89 = vector.extract_strided_slice %17 {offsets = [0, 56], sizes = [8, 8], strides = [1, 1]} : vector<8x96xf32> to vector<8x8xf32>
    %90 = arith.truncf %89 : vector<8x8xf32> to vector<8x8xbf16>
    %91 = vector.extract_strided_slice %17 {offsets = [0, 88], sizes = [8, 8], strides = [1, 1]} : vector<8x96xf32> to vector<8x8xf32>
    %92 = arith.truncf %91 : vector<8x8xf32> to vector<8x8xbf16>
    %cst_28 = arith.constant dense<0.000000e+00> : vector<8x8xf32>
    %93 = tpu.matmul %88, %90, %cst_28 {dimension_numbers = #tpu.dot_dimension_numbers<[1], [1], [0], [0], [0, 0, 1, 0], [], []>} : vector<8x8xbf16>, vector<8x8xbf16>, vector<8x8xf32> -> vector<8x8xf32>
    %cst_29 = arith.constant 0.353553385 : f32
    %94 = vector.broadcast %cst_29 : f32 to vector<8x8xf32>
    %95 = arith.mulf %93, %94 : vector<8x8xf32>
    %96 = vector.broadcast %9 : vector<1x8xf32> to vector<8x8xf32>
    %97 = arith.addf %95, %96 : vector<8x8xf32>
    %cst_30 = arith.constant dense<0xFF800000> : vector<8xf32>
    %98 = vector.multi_reduction <maximumf>, %97, %cst_30 [1] : vector<8x8xf32> to vector<8xf32>
    %99 = vector.shape_cast %98 : vector<8xf32> to vector<8x1xf32>
    %100 = vector.broadcast %99 : vector<8x1xf32> to vector<8x8xf32>
    %101 = arith.subf %97, %100 : vector<8x8xf32>
    %102 = math.exp %101 : vector<8x8xf32>
    %cst_31 = arith.constant dense<0.000000e+00> : vector<8xf32>
    %103 = vector.multi_reduction <add>, %102, %cst_31 [1] : vector<8x8xf32> to vector<8xf32>
    %104 = vector.shape_cast %103 : vector<8xf32> to vector<8x1xf32>
    %105 = tpu.reciprocal %104 {approx = true} : vector<8x1xf32> -> vector<8x1xf32>
    %106 = vector.broadcast %105 : vector<8x1xf32> to vector<8x8xf32>
    %107 = arith.mulf %102, %106 : vector<8x8xf32>
    %108 = arith.truncf %107 : vector<8x8xf32> to vector<8x8xbf16>
    %cst_32 = arith.constant dense<0.000000e+00> : vector<8x8xf32>
    %109 = tpu.matmul %108, %92, %cst_32 {dimension_numbers = #tpu.dot_dimension_numbers<[1], [0], [0], [1], [0, 0, 1, 1], [], []>} : vector<8x8xbf16>, vector<8x8xbf16>, vector<8x8xf32> -> vector<8x8xf32>
    %110 = tpu.concatenate %40, %63, %86, %109 in 1 : vector<8x8xf32>, vector<8x8xf32>, vector<8x8xf32>, vector<8x8xf32> -> vector<8x32xf32>
    %111 = arith.truncf %110 : vector<8x32xf32> to vector<8x32xbf16>
    %c0_33 = arith.constant 0 : index
    %c0_34 = arith.constant 0 : index
    %c0_35 = arith.constant 0 : index
    %112 = vector.load %arg8[%c0_33, %c0_34, %c0_35] : memref<1x32x32xbf16, #tpu.memory_space<vmem>>, vector<1x32x32xbf16>
    %113 = vector.shape_cast %112 : vector<1x32x32xbf16> to vector<32x32xbf16>
    %cst_36 = arith.constant dense<0.000000e+00> : vector<8x32xf32>
    %114 = tpu.matmul %111, %113, %cst_36 {dimension_numbers = #tpu.dot_dimension_numbers<[1], [0], [0], [1], [0, 0, 1, 1], [], []>} : vector<8x32xbf16>, vector<32x32xbf16>, vector<8x32xf32> -> vector<8x32xf32>
    %c0_37 = arith.constant 0 : index
    %c0_38 = arith.constant 0 : index
    %c0_39 = arith.constant 0 : index
    %115 = vector.load %arg9[%c0_37, %c0_38, %c0_39] : memref<1x1x32xf32, #tpu.memory_space<vmem>>, vector<1x1x32xf32>
    %116 = vector.shape_cast %115 : vector<1x1x32xf32> to vector<1x32xf32>
    %117 = vector.broadcast %116 : vector<1x32xf32> to vector<8x32xf32>
    %118 = arith.addf %114, %117 : vector<8x32xf32>
    %119 = arith.addf %118, %3 : vector<8x32xf32>
    %c0_40 = arith.constant 0 : index
    %c0_41 = arith.constant 0 : index
    %c0_42 = arith.constant 0 : index
    %120 = vector.load %arg10[%c0_40, %c0_41, %c0_42] : memref<1x1x32xf32, #tpu.memory_space<vmem>>, vector<1x1x32xf32>
    %121 = vector.shape_cast %120 : vector<1x1x32xf32> to vector<1x32xf32>
    %c0_43 = arith.constant 0 : index
    %c0_44 = arith.constant 0 : index
    %c0_45 = arith.constant 0 : index
    %122 = vector.load %arg11[%c0_43, %c0_44, %c0_45] : memref<1x1x32xf32, #tpu.memory_space<vmem>>, vector<1x1x32xf32>
    %123 = vector.shape_cast %122 : vector<1x1x32xf32> to vector<1x32xf32>
    %cst_46 = arith.constant dense<0.000000e+00> : vector<8xf32>
    %124 = vector.multi_reduction <add>, %119, %cst_46 [1] : vector<8x32xf32> to vector<8xf32>
    %125 = vector.shape_cast %124 : vector<8xf32> to vector<8x1xf32>
    %cst_47 = arith.constant 3.200000e+01 : f32
    %126 = vector.broadcast %cst_47 : f32 to vector<8x1xf32>
    %127 = arith.divf %125, %126 : vector<8x1xf32>
    %128 = vector.broadcast %127 : vector<8x1xf32> to vector<8x32xf32>
    %129 = arith.subf %119, %128 : vector<8x32xf32>
    %130 = arith.mulf %129, %129 : vector<8x32xf32>
    %cst_48 = arith.constant dense<0.000000e+00> : vector<8xf32>
    %131 = vector.multi_reduction <add>, %130, %cst_48 [1] : vector<8x32xf32> to vector<8xf32>
    %132 = vector.shape_cast %131 : vector<8xf32> to vector<8x1xf32>
    %cst_49 = arith.constant 3.200000e+01 : f32
    %133 = vector.broadcast %cst_49 : f32 to vector<8x1xf32>
    %134 = arith.divf %132, %133 : vector<8x1xf32>
    %135 = vector.broadcast %127 : vector<8x1xf32> to vector<8x32xf32>
    %136 = arith.subf %119, %135 : vector<8x32xf32>
    %cst_50 = arith.constant 9.99999974E-6 : f32
    %137 = vector.broadcast %cst_50 : f32 to vector<8x1xf32>
    %138 = arith.addf %134, %137 : vector<8x1xf32>
    %139 = math.rsqrt %138 : vector<8x1xf32>
    %140 = vector.broadcast %139 : vector<8x1xf32> to vector<8x32xf32>
    %141 = arith.mulf %136, %140 : vector<8x32xf32>
    %142 = vector.broadcast %121 : vector<1x32xf32> to vector<8x32xf32>
    %143 = arith.mulf %141, %142 : vector<8x32xf32>
    %144 = vector.broadcast %123 : vector<1x32xf32> to vector<8x32xf32>
    %145 = arith.addf %143, %144 : vector<8x32xf32>
    %146 = arith.truncf %145 : vector<8x32xf32> to vector<8x32xbf16>
    %c0_51 = arith.constant 0 : index
    %c0_52 = arith.constant 0 : index
    %c0_53 = arith.constant 0 : index
    %147 = vector.load %arg12[%c0_51, %c0_52, %c0_53] : memref<1x32x64xbf16, #tpu.memory_space<vmem>>, vector<1x32x64xbf16>
    %148 = vector.shape_cast %147 : vector<1x32x64xbf16> to vector<32x64xbf16>
    %cst_54 = arith.constant dense<0.000000e+00> : vector<8x64xf32>
    %149 = tpu.matmul %146, %148, %cst_54 {dimension_numbers = #tpu.dot_dimension_numbers<[1], [0], [0], [1], [0, 0, 1, 1], [], []>} : vector<8x32xbf16>, vector<32x64xbf16>, vector<8x64xf32> -> vector<8x64xf32>
    %c0_55 = arith.constant 0 : index
    %c0_56 = arith.constant 0 : index
    %c0_57 = arith.constant 0 : index
    %150 = vector.load %arg13[%c0_55, %c0_56, %c0_57] : memref<1x1x64xf32, #tpu.memory_space<vmem>>, vector<1x1x64xf32>
    %151 = vector.shape_cast %150 : vector<1x1x64xf32> to vector<1x64xf32>
    %152 = vector.broadcast %151 : vector<1x64xf32> to vector<8x64xf32>
    %153 = arith.addf %149, %152 : vector<8x64xf32>
    %154 = arith.mulf %153, %153 : vector<8x64xf32>
    %155 = arith.mulf %153, %154 : vector<8x64xf32>
    %cst_58 = arith.constant 4.471500e-02 : f32
    %156 = vector.broadcast %cst_58 : f32 to vector<8x64xf32>
    %157 = arith.mulf %156, %155 : vector<8x64xf32>
    %158 = arith.addf %153, %157 : vector<8x64xf32>
    %cst_59 = arith.constant 0.797884583 : f32
    %159 = vector.broadcast %cst_59 : f32 to vector<8x64xf32>
    %160 = arith.mulf %159, %158 : vector<8x64xf32>
    %161 = math.tanh %160 : vector<8x64xf32>
    %cst_60 = arith.constant 1.000000e+00 : f32
    %162 = vector.broadcast %cst_60 : f32 to vector<8x64xf32>
    %163 = arith.addf %162, %161 : vector<8x64xf32>
    %cst_61 = arith.constant 5.000000e-01 : f32
    %164 = vector.broadcast %cst_61 : f32 to vector<8x64xf32>
    %165 = arith.mulf %164, %163 : vector<8x64xf32>
    %166 = arith.mulf %153, %165 : vector<8x64xf32>
    %167 = arith.truncf %166 : vector<8x64xf32> to vector<8x64xbf16>
    %c0_62 = arith.constant 0 : index
    %c0_63 = arith.constant 0 : index
    %c0_64 = arith.constant 0 : index
    %168 = vector.load %arg14[%c0_62, %c0_63, %c0_64] : memref<1x64x32xbf16, #tpu.memory_space<vmem>>, vector<1x64x32xbf16>
    %169 = vector.shape_cast %168 : vector<1x64x32xbf16> to vector<64x32xbf16>
    %cst_65 = arith.constant dense<0.000000e+00> : vector<8x32xf32>
    %170 = tpu.matmul %167, %169, %cst_65 {dimension_numbers = #tpu.dot_dimension_numbers<[1], [0], [0], [1], [0, 0, 1, 1], [], []>} : vector<8x64xbf16>, vector<64x32xbf16>, vector<8x32xf32> -> vector<8x32xf32>
    %c0_66 = arith.constant 0 : index
    %c0_67 = arith.constant 0 : index
    %c0_68 = arith.constant 0 : index
    %171 = vector.load %arg15[%c0_66, %c0_67, %c0_68] : memref<1x1x32xf32, #tpu.memory_space<vmem>>, vector<1x1x32xf32>
    %172 = vector.shape_cast %171 : vector<1x1x32xf32> to vector<1x32xf32>
    %173 = vector.broadcast %172 : vector<1x32xf32> to vector<8x32xf32>
    %174 = arith.addf %170, %173 : vector<8x32xf32>
    %175 = arith.addf %174, %145 : vector<8x32xf32>
    %c0_69 = arith.constant 0 : index
    %c0_70 = arith.constant 0 : index
    %c0_71 = arith.constant 0 : index
    %176 = vector.load %arg16[%c0_69, %c0_70, %c0_71] : memref<1x1x32xf32, #tpu.memory_space<vmem>>, vector<1x1x32xf32>
    %177 = vector.shape_cast %176 : vector<1x1x32xf32> to vector<1x32xf32>
    %c0_72 = arith.constant 0 : index
    %c0_73 = arith.constant 0 : index
    %c0_74 = arith.constant 0 : index
    %178 = vector.load %arg17[%c0_72, %c0_73, %c0_74] : memref<1x1x32xf32, #tpu.memory_space<vmem>>, vector<1x1x32xf32>
    %179 = vector.shape_cast %178 : vector<1x1x32xf32> to vector<1x32xf32>
    %cst_75 = arith.constant dense<0.000000e+00> : vector<8xf32>
    %180 = vector.multi_reduction <add>, %175, %cst_75 [1] : vector<8x32xf32> to vector<8xf32>
    %181 = vector.shape_cast %180 : vector<8xf32> to vector<8x1xf32>
    %cst_76 = arith.constant 3.200000e+01 : f32
    %182 = vector.broadcast %cst_76 : f32 to vector<8x1xf32>
    %183 = arith.divf %181, %182 : vector<8x1xf32>
    %184 = vector.broadcast %183 : vector<8x1xf32> to vector<8x32xf32>
    %185 = arith.subf %175, %184 : vector<8x32xf32>
    %186 = arith.mulf %185, %185 : vector<8x32xf32>
    %cst_77 = arith.constant dense<0.000000e+00> : vector<8xf32>
    %187 = vector.multi_reduction <add>, %186, %cst_77 [1] : vector<8x32xf32> to vector<8xf32>
    %188 = vector.shape_cast %187 : vector<8xf32> to vector<8x1xf32>
    %cst_78 = arith.constant 3.200000e+01 : f32
    %189 = vector.broadcast %cst_78 : f32 to vector<8x1xf32>
    %190 = arith.divf %188, %189 : vector<8x1xf32>
    %191 = vector.broadcast %183 : vector<8x1xf32> to vector<8x32xf32>
    %192 = arith.subf %175, %191 : vector<8x32xf32>
    %cst_79 = arith.constant 9.99999974E-6 : f32
    %193 = vector.broadcast %cst_79 : f32 to vector<8x1xf32>
    %194 = arith.addf %190, %193 : vector<8x1xf32>
    %195 = math.rsqrt %194 : vector<8x1xf32>
    %196 = vector.broadcast %195 : vector<8x1xf32> to vector<8x32xf32>
    %197 = arith.mulf %192, %196 : vector<8x32xf32>
    %198 = vector.broadcast %177 : vector<1x32xf32> to vector<8x32xf32>
    %199 = arith.mulf %197, %198 : vector<8x32xf32>
    %200 = vector.broadcast %179 : vector<1x32xf32> to vector<8x32xf32>
    %201 = arith.addf %199, %200 : vector<8x32xf32>
    %c0_80 = arith.constant 0 : index
    %c0_81 = arith.constant 0 : index
    %202 = vector.load %arg27[%c0_80, %c0_81] : memref<8x32xf32, #tpu.memory_space<vmem>>, vector<8x32xf32>
    tpu.vector_store %arg27[%c0_80, %c0_81], %201 {strides = array<i32>} : memref<8x32xf32, #tpu.memory_space<vmem>>, vector<8x32xf32>,
    %c1_i32 = arith.constant 1 : i32
    %203 = arith.cmpi eq, %arg1, %c1_i32 : i32
    %204 = arith.extui %203 : i1 to i32
    %c0_i32_82 = arith.constant 0 : i32
    %205 = arith.cmpi ne, %204, %c0_i32_82 : i32
    scf.if %205 {
      %206 = vector.extract_strided_slice %201 {offsets = [0, 0], sizes = [1, 32], strides = [1, 1]} : vector<8x32xf32> to vector<1x32xf32>
      %207 = arith.truncf %206 : vector<1x32xf32> to vector<1x32xbf16>
      %c0_83 = arith.constant 0 : index
      %c0_84 = arith.constant 0 : index
      %208 = vector.load %arg18[%c0_83, %c0_84] : memref<32x32xbf16, #tpu.memory_space<vmem>>, vector<32x32xbf16>
      %cst_85 = arith.constant dense<0.000000e+00> : vector<1x32xf32>
      %209 = tpu.matmul %207, %208, %cst_85 {dimension_numbers = #tpu.dot_dimension_numbers<[1], [0], [0], [1], [0, 0, 1, 1], [], []>} : vector<1x32xbf16>, vector<32x32xbf16>, vector<1x32xf32> -> vector<1x32xf32>
      %c0_86 = arith.constant 0 : index
      %c0_87 = arith.constant 0 : index
      %210 = vector.load %arg19[%c0_86, %c0_87] : memref<1x32xf32, #tpu.memory_space<vmem>>, vector<1x32xf32>
      %211 = arith.addf %209, %210 : vector<1x32xf32>
      %212 = arith.mulf %211, %211 : vector<1x32xf32>
      %213 = arith.mulf %211, %212 : vector<1x32xf32>
      %cst_88 = arith.constant 4.471500e-02 : f32
      %214 = vector.broadcast %cst_88 : f32 to vector<1x32xf32>
      %215 = arith.mulf %214, %213 : vector<1x32xf32>
      %216 = arith.addf %211, %215 : vector<1x32xf32>
      %cst_89 = arith.constant 0.797884583 : f32
      %217 = vector.broadcast %cst_89 : f32 to vector<1x32xf32>
      %218 = arith.mulf %217, %216 : vector<1x32xf32>
      %219 = math.tanh %218 : vector<1x32xf32>
      %cst_90 = arith.constant 1.000000e+00 : f32
      %220 = vector.broadcast %cst_90 : f32 to vector<1x32xf32>
      %221 = arith.addf %220, %219 : vector<1x32xf32>
      %cst_91 = arith.constant 5.000000e-01 : f32
      %222 = vector.broadcast %cst_91 : f32 to vector<1x32xf32>
      %223 = arith.mulf %222, %221 : vector<1x32xf32>
      %224 = arith.mulf %211, %223 : vector<1x32xf32>
      %c0_92 = arith.constant 0 : index
      %c0_93 = arith.constant 0 : index
      %225 = vector.load %arg20[%c0_92, %c0_93] : memref<1x32xf32, #tpu.memory_space<vmem>>, vector<1x32xf32>
      %c0_94 = arith.constant 0 : index
      %c0_95 = arith.constant 0 : index
      %226 = vector.load %arg21[%c0_94, %c0_95] : memref<1x32xf32, #tpu.memory_space<vmem>>, vector<1x32xf32>
      %cst_96 = arith.constant dense<0.000000e+00> : vector<1xf32>
      %227 = vector.multi_reduction <add>, %224, %cst_96 [1] : vector<1x32xf32> to vector<1xf32>
      %228 = vector.shape_cast %227 : vector<1xf32> to vector<1x1xf32>
      %cst_97 = arith.constant 3.200000e+01 : f32
      %229 = vector.broadcast %cst_97 : f32 to vector<1x1xf32>
      %230 = arith.divf %228, %229 : vector<1x1xf32>
      %231 = vector.broadcast %230 : vector<1x1xf32> to vector<1x32xf32>
      %232 = arith.subf %224, %231 : vector<1x32xf32>
      %233 = arith.mulf %232, %232 : vector<1x32xf32>
      %cst_98 = arith.constant dense<0.000000e+00> : vector<1xf32>
      %234 = vector.multi_reduction <add>, %233, %cst_98 [1] : vector<1x32xf32> to vector<1xf32>
      %235 = vector.shape_cast %234 : vector<1xf32> to vector<1x1xf32>
      %cst_99 = arith.constant 3.200000e+01 : f32
      %236 = vector.broadcast %cst_99 : f32 to vector<1x1xf32>
      %237 = arith.divf %235, %236 : vector<1x1xf32>
      %238 = vector.broadcast %230 : vector<1x1xf32> to vector<1x32xf32>
      %239 = arith.subf %224, %238 : vector<1x32xf32>
      %cst_100 = arith.constant 9.99999974E-6 : f32
      %240 = vector.broadcast %cst_100 : f32 to vector<1x1xf32>
      %241 = arith.addf %237, %240 : vector<1x1xf32>
      %242 = math.rsqrt %241 : vector<1x1xf32>
      %243 = vector.broadcast %242 : vector<1x1xf32> to vector<1x32xf32>
      %244 = arith.mulf %239, %243 : vector<1x32xf32>
      %245 = arith.mulf %244, %225 : vector<1x32xf32>
      %246 = arith.addf %245, %226 : vector<1x32xf32>
      %247 = arith.truncf %246 : vector<1x32xf32> to vector<1x32xbf16>
      %c0_101 = arith.constant 0 : index
      %c0_102 = arith.constant 0 : index
      %248 = vector.load %arg22[%c0_101, %c0_102] : memref<32x64xbf16, #tpu.memory_space<vmem>>, vector<32x64xbf16>
      %cst_103 = arith.constant dense<0.000000e+00> : vector<1x64xf32>
      %249 = tpu.matmul %247, %248, %cst_103 {dimension_numbers = #tpu.dot_dimension_numbers<[1], [0], [0], [1], [0, 0, 1, 1], [], []>} : vector<1x32xbf16>, vector<32x64xbf16>, vector<1x64xf32> -> vector<1x64xf32>
      %c0_104 = arith.constant 0 : index
      %c0_105 = arith.constant 0 : index
      %250 = vector.load %arg23[%c0_104, %c0_105] : memref<1x64xf32, #tpu.memory_space<vmem>>, vector<1x64xf32>
      %251 = arith.addf %249, %250 : vector<1x64xf32>
      %252 = arith.truncf %251 : vector<1x64xf32> to vector<1x64xbf16>
      %c0_106 = arith.constant 0 : index
      %c0_107 = arith.constant 0 : index
      %253 = vector.load %arg24[%c0_106, %c0_107] : memref<64x16xbf16, #tpu.memory_space<vmem>>, vector<64x16xbf16>
      %cst_108 = arith.constant dense<0.000000e+00> : vector<1x16xf32>
      %254 = tpu.matmul %252, %253, %cst_108 {dimension_numbers = #tpu.dot_dimension_numbers<[1], [0], [0], [1], [0, 0, 1, 1], [], []>} : vector<1x64xbf16>, vector<64x16xbf16>, vector<1x16xf32> -> vector<1x16xf32>
      %c0_109 = arith.constant 0 : index
      %c0_110 = arith.constant 0 : index
      %255 = vector.load %arg25[%c0_109, %c0_110] : memref<1x16xf32, #tpu.memory_space<vmem>>, vector<1x16xf32>
      %256 = arith.addf %254, %255 : vector<1x16xf32>
      %c0_111 = arith.constant 0 : index
      %c0_112 = arith.constant 0 : index
      %c0_113 = arith.constant 0 : index
      %257 = vector.load %arg26[%c0_111, %c0_112, %c0_113] : memref<1x1x16xf32, #tpu.memory_space<vmem>>, vector<1x1x16xf32>
      %258 = vector.shape_cast %257 : vector<1x1x16xf32> to vector<1x16xf32>
      %259 = vector.shape_cast %256 : vector<1x16xf32> to vector<1x1x16xf32>
      tpu.vector_store %arg26[%c0_111, %c0_112, %c0_113], %259 {strides = array<i32>} : memref<1x1x16xf32, #tpu.memory_space<vmem>>, vector<1x1x16xf32>,
    } else {
    }
    return
  }
  func.func @transform_0(%arg0: i32, %arg1: i32) -> (i32, i32, i32) {
    %c0_i32 = arith.constant 0 : i32
    %c0_i32_0 = arith.constant 0 : i32
    %c0_i32_1 = arith.constant 0 : i32
    return %arg0, %c0_i32, %c0_i32_0 : i32, i32, i32
  }
  func.func @transform_1(%arg0: i32, %arg1: i32) -> (i32, i32, i32) {
    %c0_i32 = arith.constant 0 : i32
    %c0_i32_0 = arith.constant 0 : i32
    %c0_i32_1 = arith.constant 0 : i32
    return %arg0, %c0_i32, %c0_i32_0 : i32, i32, i32
  }
  func.func @transform_2(%arg0: i32, %arg1: i32) -> (i32, i32) {
    %c0_i32 = arith.constant 0 : i32
    %c0_i32_0 = arith.constant 0 : i32
    %c0_i32_1 = arith.constant 0 : i32
    return %c0_i32, %c0_i32_0 : i32, i32
  }
  func.func @transform_3(%arg0: i32, %arg1: i32) -> (i32, i32) {
    %c0_i32 = arith.constant 0 : i32
    %c0_i32_0 = arith.constant 0 : i32
    %c0_i32_1 = arith.constant 0 : i32
    return %c0_i32, %c0_i32_0 : i32, i32
  }
  func.func @transform_4(%arg0: i32, %arg1: i32) -> (i32, i32, i32) {
    %c0_i32 = arith.constant 0 : i32
    %c0_i32_0 = arith.constant 0 : i32
    %c0_i32_1 = arith.constant 0 : i32
    return %arg1, %c0_i32, %c0_i32_0 : i32, i32, i32
  }
  func.func @transform_5(%arg0: i32, %arg1: i32) -> (i32, i32, i32) {
    %c0_i32 = arith.constant 0 : i32
    %c0_i32_0 = arith.constant 0 : i32
    %c0_i32_1 = arith.constant 0 : i32
    return %arg1, %c0_i32, %c0_i32_0 : i32, i32, i32
  }
  func.func @transform_6(%arg0: i32, %arg1: i32) -> (i32, i32, i32) {
    %c0_i32 = arith.constant 0 : i32
    %c0_i32_0 = arith.constant 0 : i32
    %c0_i32_1 = arith.constant 0 : i32
    return %arg1, %c0_i32, %c0_i32_0 : i32, i32, i32
  }
  func.func @transform_7(%arg0: i32, %arg1: i32) -> (i32, i32, i32) {
    %c0_i32 = arith.constant 0 : i32
    %c0_i32_0 = arith.constant 0 : i32
    %c0_i32_1 = arith.constant 0 : i32
    return %arg1, %c0_i32, %c0_i32_0 : i32, i32, i32
  }
  func.func @transform_8(%arg0: i32, %arg1: i32) -> (i32, i32, i32) {
    %c0_i32 = arith.constant 0 : i32
    %c0_i32_0 = arith.constant 0 : i32
    %c0_i32_1 = arith.constant 0 : i32
    return %arg1, %c0_i32, %c0_i32_0 : i32, i32, i32
  }
  func.func @transform_9(%arg0: i32, %arg1: i32) -> (i32, i32, i32) {
    %c0_i32 = arith.constant 0 : i32
    %c0_i32_0 = arith.constant 0 : i32
    %c0_i32_1 = arith.constant 0 : i32
    return %arg1, %c0_i32, %c0_i32_0 : i32, i32, i32
  }
  func.func @transform_10(%arg0: i32, %arg1: i32) -> (i32, i32, i32) {
    %c0_i32 = arith.constant 0 : i32
    %c0_i32_0 = arith.constant 0 : i32
    %c0_i32_1 = arith.constant 0 : i32
    return %arg1, %c0_i32, %c0_i32_0 : i32, i32, i32
  }
  func.func @transform_11(%arg0: i32, %arg1: i32) -> (i32, i32, i32) {
    %c0_i32 = arith.constant 0 : i32
    %c0_i32_0 = arith.constant 0 : i32
    %c0_i32_1 = arith.constant 0 : i32
    return %arg1, %c0_i32, %c0_i32_0 : i32, i32, i32
  }
  func.func @transform_12(%arg0: i32, %arg1: i32) -> (i32, i32, i32) {
    %c0_i32 = arith.constant 0 : i32
    %c0_i32_0 = arith.constant 0 : i32
    %c0_i32_1 = arith.constant 0 : i32
    return %arg1, %c0_i32, %c0_i32_0 : i32, i32, i32
  }
  func.func @transform_13(%arg0: i32, %arg1: i32) -> (i32, i32, i32) {
    %c0_i32 = arith.constant 0 : i32
    %c0_i32_0 = arith.constant 0 : i32
    %c0_i32_1 = arith.constant 0 : i32
    return %arg1, %c0_i32, %c0_i32_0 : i32, i32, i32
  }
  func.func @transform_14(%arg0: i32, %arg1: i32) -> (i32, i32, i32) {
    %c0_i32 = arith.constant 0 : i32
    %c0_i32_0 = arith.constant 0 : i32
    %c0_i32_1 = arith.constant 0 : i32
    return %arg1, %c0_i32, %c0_i32_0 : i32, i32, i32
  }
  func.func @transform_15(%arg0: i32, %arg1: i32) -> (i32, i32, i32) {
    %c0_i32 = arith.constant 0 : i32
    %c0_i32_0 = arith.constant 0 : i32
    %c0_i32_1 = arith.constant 0 : i32
    return %arg1, %c0_i32, %c0_i32_0 : i32, i32, i32
  }
  func.func @transform_16(%arg0: i32, %arg1: i32) -> (i32, i32) {
    %c0_i32 = arith.constant 0 : i32
    %c0_i32_0 = arith.constant 0 : i32
    %c0_i32_1 = arith.constant 0 : i32
    return %c0_i32, %c0_i32_0 : i32, i32
  }
  func.func @transform_17(%arg0: i32, %arg1: i32) -> (i32, i32) {
    %c0_i32 = arith.constant 0 : i32
    %c0_i32_0 = arith.constant 0 : i32
    %c0_i32_1 = arith.constant 0 : i32
    return %c0_i32, %c0_i32_0 : i32, i32
  }
  func.func @transform_18(%arg0: i32, %arg1: i32) -> (i32, i32) {
    %c0_i32 = arith.constant 0 : i32
    %c0_i32_0 = arith.constant 0 : i32
    %c0_i32_1 = arith.constant 0 : i32
    return %c0_i32, %c0_i32_0 : i32, i32
  }
  func.func @transform_19(%arg0: i32, %arg1: i32) -> (i32, i32) {
    %c0_i32 = arith.constant 0 : i32
    %c0_i32_0 = arith.constant 0 : i32
    %c0_i32_1 = arith.constant 0 : i32
    return %c0_i32, %c0_i32_0 : i32, i32
  }
  func.func @transform_20(%arg0: i32, %arg1: i32) -> (i32, i32) {
    %c0_i32 = arith.constant 0 : i32
    %c0_i32_0 = arith.constant 0 : i32
    %c0_i32_1 = arith.constant 0 : i32
    return %c0_i32, %c0_i32_0 : i32, i32
  }
  func.func @transform_21(%arg0: i32, %arg1: i32) -> (i32, i32) {
    %c0_i32 = arith.constant 0 : i32
    %c0_i32_0 = arith.constant 0 : i32
    %c0_i32_1 = arith.constant 0 : i32
    return %c0_i32, %c0_i32_0 : i32, i32
  }
  func.func @transform_22(%arg0: i32, %arg1: i32) -> (i32, i32) {
    %c0_i32 = arith.constant 0 : i32
    %c0_i32_0 = arith.constant 0 : i32
    %c0_i32_1 = arith.constant 0 : i32
    return %c0_i32, %c0_i32_0 : i32, i32
  }
  func.func @transform_23(%arg0: i32, %arg1: i32) -> (i32, i32) {
    %c0_i32 = arith.constant 0 : i32
    %c0_i32_0 = arith.constant 0 : i32
    %c0_i32_1 = arith.constant 0 : i32
    return %c0_i32, %c0_i32_0 : i32, i32
  }
  func.func @transform_24(%arg0: i32, %arg1: i32) -> (i32, i32, i32) {
    %c0_i32 = arith.constant 0 : i32
    %c0_i32_0 = arith.constant 0 : i32
    %c0_i32_1 = arith.constant 0 : i32
    return %arg0, %c0_i32, %c0_i32_0 : i32, i32, i32
  }
}

</mosaic_0001>

<bundles_post_ra>
// kernel: chembert_encoder_forward.1
= control target key start
LH: loop header
LB: loop body
LE: loop exit
PB: predicated region body
PF: predicated region fallthrough
CT: control target
= control target key end

     0   :  { %s3249_s0 = inlined_call_operand.vmem [shape: f32[2,8,32], index: 0, kind: input, shape index: {}]   ;;  %s3250_s1 = inlined_call_operand.vmem [shape: f32[2,1,8], index: 1, kind: input, shape index: {}]   ;;  %s3251_s2 = inlined_call_operand.vmem [shape: f32[1,32], index: 2, kind: input, shape index: {}]   ;;  %s3252_s3 = inlined_call_operand.vmem [shape: f32[1,32], index: 3, kind: input, shape index: {}]   ;;  %s3253_s4 = inlined_call_operand.vmem [shape: bf16[2,32,96], index: 4, kind: input, shape index: {}]   ;;  %s3254_s5 = inlined_call_operand.vmem [shape: f32[2,1,96], index: 5, kind: input, shape index: {}]   ;;  %s3255_s6 = inlined_call_operand.vmem [shape: bf16[2,32,32], index: 6, kind: input, shape index: {}]   ;;  %s3256_s7 = inlined_call_operand.vmem [shape: f32[2,1,32], index: 7, kind: input, shape index: {}]   ;;  %s3257_s8 = inlined_call_operand.vmem [shape: f32[2,1,32], index: 8, kind: input, shape index: {}]   ;;  %s3258_s9 = inlined_call_operand.vmem [shape: f32[2,1,32], index: 9, kind: input, shape index: {}]   ;;  %s3259_s10 = inlined_call_operand.vmem [shape: bf16[2,32,64], index: 10, kind: input, shape index: {}]   ;;  %s3260_s11 = inlined_call_operand.vmem [shape: f32[2,1,64], index: 11, kind: input, shape index: {}]   ;;  %s3261_s12 = inlined_call_operand.vmem [shape: bf16[2,64,32], index: 12, kind: input, shape index: {}]   ;;  %s3262_s13 = inlined_call_operand.vmem [shape: f32[2,1,32], index: 13, kind: input, shape index: {}]   ;;  %s3263_s14 = inlined_call_operand.vmem [shape: f32[2,1,32], index: 14, kind: input, shape index: {}]   ;;  %s3264_s15 = inlined_call_operand.vmem [shape: f32[2,1,32], index: 15, kind: input, shape index: {}]   ;;  %s3265_s16 = inlined_call_operand.vmem [shape: bf16[32,32], index: 16, kind: input, shape index: {}]   ;;  %s3266_s17 = inlined_call_operand.vmem [shape: f32[1,32], index: 17, kind: input, shape index: {}]   ;;  %s3267_s18 = inlined_call_operand.vmem [shape: f32[1,32], index: 18, kind: input, shape index: {}]   ;;  %s3268_s19 = inlined_call_operand.vmem [shape: f32[1,32], index: 19, kind: input, shape index: {}]   ;;  %s3269_s20 = inlined_call_operand.vmem [shape: bf16[32,64], index: 20, kind: input, shape index: {}]   ;;  %s3270_s21 = inlined_call_operand.vmem [shape: f32[1,64], index: 21, kind: input, shape index: {}]   ;;  %s3271_s22 = inlined_call_operand.vmem [shape: bf16[64,16], index: 22, kind: input, shape index: {}]   ;;  %s3272_s23 = inlined_call_operand.vmem [shape: f32[1,16], index: 23, kind: input, shape index: {}]   ;;  %s3273_s24 = inlined_call_operand.hbm [shape: f32[2,1,16], index: 24, kind: output, shape index: {}]  }
   0x1   :  { %3292 = sst [smem:[#allocation20_spill]] %s3249_s0 }
   0x2   :  { %3293 = sst [smem:[#allocation21_spill]] %s3250_s1 }
   0x3   :  { %3294 = sst [smem:[#allocation22_spill]] %s3251_s2 }
   0x4   :  { %3295 = sst [smem:[#allocation23_spill]] %s3252_s3 }
   0x5   :  { %3296 = sst [smem:[#allocation24_spill]] %s3253_s4 }
   0x6   :  { %3297 = sst [smem:[#allocation25_spill]] %s3254_s5 }
   0x7   :  { %3298 = sst [smem:[#allocation26_spill]] %s3255_s6 }
   0x8   :  { %3299 = sst [smem:[#allocation27_spill]] %s3256_s7 }
   0x9   :  { %3300 = sst [smem:[#allocation28_spill]] %s3257_s8 }
   0xa   :  { %3301 = sst [smem:[#allocation29_spill]] %s3265_s16 }
   0xb   :  { %3302 = sst [smem:[#allocation30_spill]] %s3266_s17 }
   0xc   :  { %3303 = sst [smem:[#allocation31_spill]] %s3267_s18 }
   0xd   :  { %3304 = sst [smem:[#allocation32_spill]] %s3268_s19 }
   0xe   :  { %3305 = sst [smem:[#allocation33_spill]] %s3269_s20 }
   0xf   :  { %3306 = sst [smem:[#allocation34_spill]] %s3270_s21 }
  0x10   :  { %3307 = sst [smem:[#allocation35_spill]] %s3271_s22 }
  0x11   :  { %3308 = sst [smem:[#allocation36_spill]] %s3272_s23 }
  0x12   :  { %3309 = sst [smem:[#allocation37_spill]] %s3273_s24 }
  0x13   :  { %29 = vsyncpa [#allocation4], 0 }
  0x14   :  { %31 = vsyncpa [#allocation4 + $0x1], 0  ;;  %s2854_s5 = smov 0   ;;  %s2856_s26 = smov 0  }
  0x15   :  { %s2858_s27 = smov 0   ;;  %s2860_s28 = smov 0  }
  0x16   :  { %s2862_s6 = smov 0   ;;  %s2864_s2 = smov 0  }
  0x17   :  { %s2866_s29 = smov 0   ;;  %s2868_s0 = smov 0  }
  0x18 LB: > { %3310 = sst [smem:[#allocation6_spill]] %s2680_s5  ;;  %s2262_s7 = sadd.s32 4294967295, %s2708_s0   ;;  %s2708_s0 = sphi %s2868_s0, %s37_s0   ;;  %s2704_s29 = sphi %s2866_s29, %s3367_s29   ;;  %s2700_s2 = sphi %s2864_s2, %s3366_s2   ;;  %s2696_s6 = sphi %s2862_s6, %s3365_s6   ;;  %s2692_s28 = sphi %s2860_s28, %s3364_s28   ;;  %s2688_s27 = sphi %s2858_s27, %s3363_s27   ;;  %s2684_s26 = sphi %s2856_s26, %s3369_s26   ;;  %s2680_s5 = sphi %s2854_s5, %s3368_s5  }
  0x19   : > { %3311 = sst [smem:[#allocation7_spill]] %s2688_s27  ;;  %s2263_s30 = sadd.s32 4294967294, %s2708_s0  }
  0x1a   : > { %3312 = sst [smem:[#allocation8_spill]] %s2692_s28  ;;  %s46_s3 = sadd.s32 1, %s2700_s2 }
  0x1b   : > { %3313 = sst [smem:[#allocation9_spill]] %s2696_s6  ;;  %p47_p0 = scmp.ge.s32.totalorder %s46_s3, 2 }
  0x1c   : > { %3314 = sst [smem:[#allocation10_spill]] %s2700_s2  ;;  %s49_s25 = sadd.s32 1, %s2704_s29 }
  0x1d   : > { %3315 = sst [smem:[#allocation11_spill]] %s2704_s29  ;;  %p640_p1 = scmp.ne.s32.totalorder %s2688_s27, %s2684_s26 }
  0x1e   : > { %3316 = sst [smem:[#allocation12_spill]] %s2708_s0  ;;  %p641_p2 = scmp.eq.s32.totalorder %s2262_s7, 3 }
  0x1f   : > { %s3371_s3 = smov (%p47_p0, %s46_s3), 0  ;;  %s3373_s25 = smov (!%p47_p0, %s49_s25), %s2704_s29 }
  0x20   : > { %3317 = sst [smem:[#allocation13_spill]] %s3371_s3  ;;  %p2903_p3 = por %p641_p2, %p640_p1 }
  0x21   : > { %p646_p4 = scmp.ne.s32.totalorder %s2684_s26, %s2680_s5  ;;  %p51_p5 = scmp.ge.s32.totalorder %s3373_s25, 2 }
  0x22   : > { %s3318_s8 = scalar_select %p2903_p3, 1, 0 }
  0x23   : > { %p647_p6 = scmp.eq.s32.totalorder %s2263_s30, 3  ;;  %p2266_p7 = scmp.ge.s32.totalorder %s2708_s0, 1 }
  0x24   : > { %3319 = sst [smem:[#allocation14_spill]] %s3318_s8  ;;  %p788_p8 = scmp.lt.s32.totalorder %s2708_s0, 5 }
  0x25   : > { %s3375_s25 = smov (%p51_p5, %s3373_s25), 0  ;;  %p2913_p9 = por %p647_p6, %p646_p4 }
  0x26   : > { %3320 = sst [smem:[#allocation15_spill]] %s3375_s25  ;;  %p789_p10 = pnand %p2266_p7, %p788_p8 }
  0x27   : > { %s3321_s4 = scalar_select %p2913_p9, 1, 0 }
  0x28   : > { %s627_s1 = ssub.s32 %s2704_s29, %s3375_s25  ;;  %s630_s7 = sadd.s32 1, %s2688_s27 }
  0x29   : > { %3322 = sst [smem:[#allocation16_spill]] %s3321_s4  ;;  %p628_p11 = scmp.eq.s32.totalorder %s627_s1, 0 }
  0x2a   : > { %792 = sbr.rel (%p789_p10) target bundleno = 3809 (0xee1), region = 116 }
  0x2b   : > { %s2921_s3 = scalar_select %p628_p11, %s2688_s27, %s630_s7  }
  0x2d   : > { %3323 = sst [smem:[#allocation17_spill]] %s2921_s3 }
  0x2f   : > { %p899_p12 = scmp.lt.s32.totalorder %s2696_s6, 1  ;;  %p906_p13 = scmp.lt.s32.totalorder %s2692_s28, 1 }
  0x30   : > { %s3326_s5 = sld [smem:[#allocation20_spill]]  ;;  %s3333_s16 = sand.u32 1, %s2684_s26  }
  0x31   : > { %s2927_s2 = scalar_select %p899_p12, %s2696_s6, 1 }
  0x32   : > { %s2930_s4 = scalar_select %p906_p13, %s2692_s28, 1 }
  0x33   : > { %3324 = sst [smem:[#allocation18_spill]] %s2927_s2  ;;  %s2267_s1 = sshll.u32 %s2927_s2, 3 }
  0x34   : > { %s2324_s24 = sshll.u32 %s2930_s4, 4  ;;  %s3327_s23 = sld [smem:[#allocation24_spill]] }
  0x35   : > { %s3329_s22 = sld [smem:[#allocation25_spill]]  ;;  %s2970_s19 = scalar_lea.vmem %s3259_s10, %s2324_s24 }
  0x36   : > { %s902_s0 = scalar_lea.vmem %s3326_s5, %s2267_s1  ;;  %s3330_s30 = sld [smem:[#allocation26_spill]] }
  0x37   : > { %s3331_s27 = sld [smem:[#allocation27_spill]]  ;;  %s949_s8 = scalar_lea.vmem %s3264_s15, %s2930_s4 }
  0x38   : > { %s3332_s2 = sld [smem:[#allocation28_spill]]  ;;  %s2996_s17 = scalar_lea.vmem [#allocation3], %s3333_s16 }
  0x3a   : > { %s2944_s21 = scalar_lea.vmem %s3327_s23, %s2324_s24 }
  0x3b   : > { %3328 = sst [smem:[#allocation19_spill]] %s2944_s21  ;;  %s913_s20 = scalar_lea.vmem %s3329_s22, %s2930_s4 }
  0x3c   : > { %s2953_s7 = scalar_lea.vmem %s3330_s30, %s2324_s24  ;;  %s2327_s30 = sshll.u32 %s2930_s4, 5 }
  0x3d   : > { %s921_s3 = scalar_lea.vmem %s3331_s27, %s2930_s4  ;;  %s943_s27 = scalar_lea.vmem %s3262_s13, %s2930_s4 }
  0x3e   : > { %s924_s28 = scalar_lea.vmem %s3332_s2, %s2930_s4  ;;  %s2984_s1 = scalar_lea.vmem %s3261_s12, %s2327_s30 }
  0x3f   : > { %s946_s21 = scalar_lea.vmem %s3263_s14, %s2930_s4  ;;  %s3334_s22 = sld [smem:[#allocation8_spill]] }
  0x45   : > { %p2276_p0 = scmp.ne.s32.totalorder %s3334_s22, 0 }
  0x46   : > { %s3335_s29 = sld [smem:[#allocation22_spill]] (!%p2276_p0) }
  0x47   : > { %954 = sbr.rel (%p2276_p0) target bundleno = 386 (0x182), region = 120  ;;  %s3336_s5 = sld [smem:[#allocation23_spill]] (!%p2276_p0) }
  0x4c   : > { %v955_v0 = vld [vmem:[%s902_s0] sm:$0xff]  ;;  %vm958_vm0 = vcmask 261120  }
  0x4d   : > { %v959_v1 = vsel %vm958_vm0, %v955_v0, 0.0  ;;  %v2277_v11 = vld [vmem:[%s3335_s29] ss:$0 sm:$0xff] }
  0x4e   : > { %960 = vadd.xlane.f32.xlu0 %v959_v1  ;;  %v2278_v13 = vld [vmem:[%s3336_s5] ss:$0 sm:$0xff] }
  0xd7   : > { %v961_v2 = vpop.xlane.xlu0 %960 }
  0xd8   : > { %v963_v3 = vmul.f32 0.03125, %v961_v2 }
  0xda   : > { %v964_v4 = vsub.f32 %v955_v0, %v963_v3 }
  0xdc   : > { %v965_v5 = vmul.f32 %v964_v4, %v964_v4 }
  0xde   : > { %v966_v6 = vsel %vm958_vm0, %v965_v5, 0.0 }
  0xdf   : > { %967 = vadd.xlane.f32.xlu0 %v966_v6 }
 0x168   : > { %v968_v7 = vpop.xlane.xlu0 %967 }
 0x169   : > { %v969_v8 = vmul.f32 0.03125, %v968_v7 }
 0x16b   : > { %v970_v9 = vadd.f32 1e-05, %v969_v8 }
 0x16d   : > { %2570 = vrsqrt.f32 %v970_v9 }
 0x17a   : > { %v2571_v10 = vpop.eup %2570 }
 0x17b   : > { %v972_v12 = vmul.f32 %v2571_v10, %v964_v4 }
 0x17d   : > { %v979_v14 = vmul.f32 %v2277_v11, %v972_v12 }
 0x17f   : > { %v986_v15 = vadd.f32 %v2278_v13, %v979_v14 }
 0x181   : > { %987 = vst.msk [vmem:[#allocation2] sm:$0xff] %vm958_vm0, %v986_v15 }
 0x182 PF: > { %s3337_s2 = sld [smem:[#allocation19_spill]]  ;;  %v2710_v17 = vmov 0.0   ;;  %vm2711_vm1 = vmmov 0   ;;  %vm1016_vm2 = vcmask 261120   ;;  %v2279_v21 = vld [vmem:[%s913_s20] ss:$0 sm:$0xff]  ;;  %v1113_v39 = vlaneseq }
 0x183   : > { %2369 = vmatprep.subr.bf16.mxu0 %v2710_v17  ;;  %2377 = vmatprep.subr.bf16.mxu1 %v2710_v17  ;;  %s2712_s18 = smov 120   ;;  %s2713_s16 = smov 96   ;;  %vm1064_vm3 = vcmask 64512   ;;  %vm1136_vm4 = vcmask 1043456   ;;  %vm1529_vm5 = vcmask 130048   ;;  %vm1531_vm6 = vcmask 195584  }
 0x184   : > { %2373 = vmatprep.mubr.msk.bf16.mxu0 %vm2711_vm1, %v2710_v17  ;;  %2379 = vmatprep.mubr.msk.bf16.mxu1 %vm2711_vm1, %v2710_v17  ;;  %s2714_s30 = smov 80   ;;  %s2715_s22 = smov 88   ;;  %v1114_v42 = vshrl.u32 %v1113_v39, 7  ;;  %vm1747_vm7 = vcmask 523264  }
 0x185   : > { %s2716_s20 = smov 72   ;;  %s2717_s29 = smov 112  }
 0x186   : > { %s2718_s0 = smov 104   ;;  %s3339_s25 = sld [smem:[#allocation18_spill]]  ;;  %v1115_v44 = vsub.s32 0, %v1114_v42 }
 0x187   : > { %s3340_s6 = sld [smem:[#allocation21_spill]]  ;;  %s2719_s24 = smov 56  }
 0x188   : > { %v2572_v16 = vld [vmem:[%s3337_s2 + $0x8] sm:$0xff]   ;;  %v2573_v18 = vld [vmem:[%s3337_s2] sm:$0xff]  }
 0x189   : > { %2370 = vmatpush3.bf16.msra.mxu0 %v2572_v16  ;;  %v3014_v19 = vld [vmem:[#allocation2] sm:$0xff] }
 0x18a   : > { %2371 = vmatprep.subr.bf16.mxu0 %v2710_v17  ;;  %v992_v20 = vpack.c.bf16 %v3014_v19, %v3014_v19 }
 0x18d   : > { %2372 = vmatpush3.bf16.msra.mxu0 %v2573_v18  ;;  %s3341_s23 = scalar_lea.vmem %s3340_s6, %s3339_s25 }
 0x18e   : > { %2383 = vmatprep.subr.bf16.mxu0 %v2710_v17  ;;  %v989_v40 = vld [vmem:[%s3341_s23] sm:$0x1] }
 0x18f   : > { %v990_v41 = vsub.f32 1.0, %v989_v40 }
 0x190   : > { %2374 = vmatmul.mubr.msk.bf16.vlgmr.msra.gmra.mxu0 %vm1016_vm2, %v992_v20 }
 0x191   : > { %2385 = vmatprep.mubr.msk.bf16.mxu0 %vm2711_vm1, %v2710_v17  ;;  %v991_v43 = vmul.f32 -1e+09, %v990_v41 }
 0x193   : > { %v1116_v45 = vrot.slane %v991_v43, %v1115_v44 }
 0x250   : > { %v1054_v22 = vpop.f32.mrf.mxu0 }
 0x251   : > { %v1055_v23 = vadd.f32 %v2279_v21, %v1054_v22 }
 0x252   : > { %v2375_v24 = vpop.f32.mrf.mxu0 }
 0x253   : > { %v3030_v25 = vpack.c.bf16 %v1055_v23, %v1055_v23 }
 0x254   : > { %v1057_v26 = vpop.f32.mrf.mxu0 }
 0x255   : > { %1180 = vrot.lane.b32.xlu1 %v3030_v25, %s2712_s18  ;;  %1062 = vrot.lane.b32.xlu0 %v3030_v25, %s2713_s16  ;;  %s2720_s18 = smov 64   ;;  %s2721_s16 = smov 40  }
 0x256   : > { %v2376_v27 = vpop.f32.mrf.mxu0 }
 0x259   : > { %1294 = vrot.lane.b32.xlu1 %v3030_v25, %s2714_s30  ;;  %1182 = vrot.lane.b32.xlu0 %v3030_v25, %s2715_s22  ;;  %s2722_s30 = smov 48   ;;  %s2723_s22 = smov 8  }
 0x25d   : > { %1406 = vrot.lane.b32.xlu1 %v3030_v25, %s2716_s20  ;;  %1292 = vrot.lane.b32.xlu0 %v3030_v25, %s2717_s29  ;;  %s2724_s20 = smov 16   ;;  %s2725_s29 = smov 24  }
 0x261   : > { %1404 = vrot.lane.b32.xlu0 %v3030_v25, %s2718_s0 }
 0x2c7   : > { %v1063_v28 = vpop.permute.xlu0 %1062  ;;  %v1181_v31 = vpop.permute.xlu1 %1180 }
 0x2c8   : > { %v1069_v29 = vsel %vm1064_vm3, %v1063_v28, 0 }
 0x2c9   : > { %2378 = vmatpush3.bf16.xpose.msra.mxu1 %v1069_v29 }
 0x2ca   : > { %2389 = vmatprep.subr.bf16.mxu1 %v2710_v17 }
 0x2cb   : > { %v1183_v30 = vpop.permute.xlu0 %1182  ;;  %v1295_v33 = vpop.permute.xlu1 %1294 }
 0x2cc   : > { %v1188_v32 = vsel %vm1064_vm3, %v1183_v30, 0  ;;  %v1300_v34 = vsel %vm1064_vm3, %v1295_v33, 0 }
 0x2cf   : > { %v1407_v35 = vpop.permute.xlu1 %1406  ;;  %v1293_v36 = vpop.permute.xlu0 %1292 }
 0x2d0   : > { %2380 = vmatmul.mubr.msk.bf16.vlgmr.msra.gmra.mxu1 %vm1064_vm3, %v3030_v25  ;;  %v1412_v37 = vsel %vm1064_vm3, %v1407_v35, 0 }
 0x2d1   : > { %2390 = vmatpush3.bf16.xpose.msra.mxu1 %v1188_v32  ;;  %2391 = vmatprep.mubr.msk.bf16.mxu1 %vm2711_vm1, %v2710_v17 }
 0x2d2   : > { %2401 = vmatprep.subr.bf16.mxu1 %v2710_v17 }
 0x2d3   : > { %v1405_v38 = vpop.permute.xlu0 %1404 }
 0x2d8   : > { %2392 = vmatmul.mubr.msk.bf16.vlgmr.msra.gmra.mxu1 %vm1064_vm3, %v1181_v31 }
 0x2d9   : > { %2402 = vmatpush3.bf16.xpose.msra.mxu1 %v1300_v34  ;;  %2403 = vmatprep.mubr.msk.bf16.mxu1 %vm2711_vm1, %v2710_v17 }
 0x2da   : > { %2413 = vmatprep.subr.bf16.mxu1 %v2710_v17 }
 0x2e0   : > { %2404 = vmatmul.mubr.msk.bf16.vlgmr.msra.gmra.mxu1 %vm1064_vm3, %v1293_v36 }
 0x2e1   : > { %2414 = vmatpush3.bf16.xpose.msra.mxu1 %v1412_v37  ;;  %2415 = vmatprep.mubr.msk.bf16.mxu1 %vm2711_vm1, %v2710_v17 }
 0x2e2   : > { %2425 = vmatprep.subr.bf16.mxu1 %v2710_v17 }
 0x2e8   : > { %2416 = vmatmul.mubr.msk.bf16.vlgmr.msra.gmra.mxu1 %vm1064_vm3, %v1405_v38 }
 0x2e9   : > { %2429 = vmatprep.mubr.msk.bf16.mxu1 %vm2711_vm1, %v2710_v17 }
 0x390   : > { %v1105_v46 = vpop.f32.mrf.mxu1 }
 0x391   : > { %v1111_v47 = vmul.f32 0.35355338, %v1105_v46 }
 0x392   : > { %v2381_v48 = vpop.f32.mrf.mxu1 }
 0x393   : > { %v1118_v49 = vadd.f32 %v1116_v45, %v1111_v47 }
 0x394   : > { %v1108_v50 = vpop.f32.mrf.mxu1 }
 0x395   : > { %v1119_v51 = vsel %vm1064_vm3, %v1118_v49, -inf }
 0x396   : > { %1120 = vmax.xlane.f32.xlu1 %v1119_v51  ;;  %v2382_v52 = vpop.f32.mrf.mxu1 }
 0x398   : > { %v1224_v53 = vpop.f32.mrf.mxu1 }
 0x399   : > { %v1230_v54 = vmul.f32 0.35355338, %v1224_v53 }
 0x39a   : > { %v2393_v55 = vpop.f32.mrf.mxu1 }
 0x39b   : > { %v1231_v56 = vadd.f32 %v1230_v54, %v1116_v45 }
 0x39c   : > { %v1227_v57 = vpop.f32.mrf.mxu1 }
 0x39d   : > { %v1232_v58 = vsel %vm1064_vm3, %v1231_v56, -inf }
 0x39e   : > { %1233 = vmax.xlane.f32.xlu0 %v1232_v58  ;;  %v2394_v59 = vpop.f32.mrf.mxu1 }
 0x3a0   : > { %v1336_v60 = vpop.f32.mrf.mxu1 }
 0x3a1   : > { %v1342_v61 = vmul.f32 0.35355338, %v1336_v60 }
 0x3a2   : > { %v2405_v62 = vpop.f32.mrf.mxu1 }
 0x3a3   : > { %v1343_v63 = vadd.f32 %v1342_v61, %v1116_v45 }
 0x3a4   : > { %v1339_v0 = vpop.f32.mrf.mxu1 }
 0x3a5   : > { %v1344_v1 = vsel %vm1064_vm3, %v1343_v63, -inf  ;;  %v2574_v0 = vld [vmem:[%s2953_s7 + $0x8] sm:$0xff]  }
 0x3a6   : > { %1345 = vmax.xlane.f32.xlu0 %v1344_v1  ;;  %v2406_v2 = vpop.f32.mrf.mxu1  ;;  %2426 = vmatpush3.bf16.msra.mxu1 %v2574_v0  ;;  %v2575_v1 = vld [vmem:[%s2953_s7] sm:$0xff]  }
 0x3a7   : > { %2427 = vmatprep.subr.bf16.mxu1 %v2710_v17 }
 0x3a8   : > { %v1448_v3 = vpop.f32.mrf.mxu1 }
 0x3a9   : > { %v1454_v4 = vmul.f32 0.35355338, %v1448_v3 }
 0x3aa   : > { %v2417_v5 = vpop.f32.mrf.mxu1  ;;  %2428 = vmatpush3.bf16.msra.mxu1 %v2575_v1 }
 0x3ab   : > { %v1455_v6 = vadd.f32 %v1454_v4, %v1116_v45  ;;  %2441 = vmatprep.subr.bf16.mxu1 %v2710_v17 }
 0x3ac   : > { %v1451_v7 = vpop.f32.mrf.mxu1 }
 0x3ad   : > { %v1456_v8 = vsel %vm1064_vm3, %v1455_v6, -inf }
 0x3ae   : > { %1457 = vmax.xlane.f32.xlu1 %v1456_v8  ;;  %v2418_v9 = vpop.f32.mrf.mxu1 }
 0x41f   : > { %v1121_v10 = vpop.xlane.xlu1 %1120 }
 0x420   : > { %v1122_v11 = vsub.f32 %v1118_v49, %v1121_v10 }
 0x422   : > { %v1123_v12 = vmul.f32 1.442695, %v1122_v11 }
 0x424   : > { %2582 = vpow2.f32 %v1123_v12 }
 0x427   : > { %v1234_v13 = vpop.xlane.xlu0 %1233 }
 0x428   : > { %v1235_v14 = vsub.f32 %v1231_v56, %v1234_v13 }
 0x42a   : > { %v1236_v15 = vmul.f32 1.442695, %v1235_v14 }
 0x42c   : > { %2584 = vpow2.f32 %v1236_v15 }
 0x42f   : > { %v1346_v16 = vpop.xlane.xlu0 %1345 }
 0x430   : > { %v1347_v18 = vsub.f32 %v1343_v63, %v1346_v16 }
 0x431   : > { %v2583_v20 = vpop.eup %2582 }
 0x432   : > { %v1348_v21 = vmul.f32 1.442695, %v1347_v18  ;;  %v1125_v22 = vsel %vm1064_vm3, %v2583_v20, 0.0  ;;  %v2291_v18 = vld [vmem:[%s921_s3] ss:$0 sm:$0xff] }
 0x433   : > { %1126 = vadd.xlane.f32.xlu0 %v1125_v22 }
 0x434   : > { %2586 = vpow2.f32 %v1348_v21 }
 0x437   : > { %v1458_v28 = vpop.xlane.xlu1 %1457 }
 0x438   : > { %v1459_v29 = vsub.f32 %v1455_v6, %v1458_v28 }
 0x439   : > { %v2585_v23 = vpop.eup %2584 }
 0x43a   : > { %v1238_v24 = vsel %vm1064_vm3, %v2585_v23, 0.0  ;;  %v1460_v30 = vmul.f32 1.442695, %v1459_v29 }
 0x43b   : > { %1239 = vadd.xlane.f32.xlu1 %v1238_v24 }
 0x43c   : > { %2588 = vpow2.f32 %v1460_v30 }
 0x441   : > { %v2587_v26 = vpop.eup %2586 }
 0x442   : > { %v1350_v27 = vsel %vm1064_vm3, %v2587_v26, 0.0 }
 0x443   : > { %1351 = vadd.xlane.f32.xlu0 %v1350_v27 }
 0x449   : > { %v2589_v31 = vpop.eup %2588 }
 0x44a   : > { %v1462_v32 = vsel %vm1064_vm3, %v2589_v31, 0.0 }
 0x44c   : > { %1244 = vrot.lane.b32.xlu1 %v3030_v25, %s2719_s24 }
 0x459   : > { %1131 = vrot.lane.b32.xlu0 %v3030_v25, %s2720_s18  ;;  %s3345_s18 = scalar_lea.vmem %s3260_s11, %s2930_s4 }
 0x45d   : > { %1468 = vrot.lane.b32.xlu0 %v3030_v25, %s2721_s16 }
 0x470   : > { %1463 = vadd.xlane.f32.xlu1 %v1462_v32 }
 0x481   : > { %1356 = vrot.lane.b32.xlu1 %v3030_v25, %s2722_s30 }
 0x4bc   : > { %v1127_v33 = vpop.xlane.xlu0 %1126 }
 0x4bd   : > { %2590 = vrcp.f32 %v1127_v33  ;;  %v2576_v33 = vld [vmem:[%s2970_s19 + $0x8] sm:$0xff]  }
 0x4c4   : > { %v1240_v34 = vpop.xlane.xlu1 %1239 }
 0x4c5   : > { %2592 = vrcp.f32 %v1240_v34  ;;  %v2577_v34 = vld [vmem:[%s2970_s19] sm:$0xff]   ;;  %s3344_s19 = scalar_lea.vmem %s3258_s9, %s2930_s4 }
 0x4c8   : > { %v1245_v40 = vpop.permute.xlu1 %1244 }
 0x4c9   : > { %v1250_v43 = vsel %vm1136_vm4, %v1245_v40, 0  ;;  %v2296_v40 = vld [vmem:[%s3344_s19] ss:$0 sm:$0xff] }
 0x4ca   : > { %v2591_v35 = vpop.eup %2590 }
 0x4cb   : > { %v1129_v37 = vmul.f32 %v2591_v35, %v2583_v20 }
 0x4cc   : > { %v1352_v36 = vpop.xlane.xlu0 %1351 }
 0x4cd   : > { %v1130_v41 = vpack.c.bf16 %v1129_v37, %v1129_v37  ;;  %2594 = vrcp.f32 %v1352_v36 }
 0x4d0   : > { %v1132_v38 = vpop.permute.xlu0 %1131 }
 0x4d1   : > { %v1138_v39 = vsel %vm1136_vm4, %v1132_v38, 0  ;;  %v2295_v38 = vld [vmem:[%s924_s28] ss:$0 sm:$0xff] }
 0x4d2   : > { %2384 = vmatpush3.bf16.msra.mxu0 %v1138_v39  ;;  %v2593_v42 = vpop.eup %2592 }
 0x4d3   : > { %2395 = vmatprep.subr.bf16.mxu0 %v2710_v17  ;;  %v1242_v25 = vmul.f32 %v2593_v42, %v2585_v23 }
 0x4d4   : > { %v1469_v50 = vpop.permute.xlu0 %1468 }
 0x4d5   : > { %2386 = vmatmul.mubr.msk.bf16.vlgmr.msra.gmra.mxu0 %vm1064_vm3, %v1130_v41  ;;  %v1243_v44 = vpack.c.bf16 %v1242_v25, %v1242_v25  ;;  %v1474_v52 = vsel %vm1136_vm4, %v1469_v50, 0  ;;  %v2578_v25 = vld [vmem:[%s2984_s1 + $0x18] sm:$0xff]  }
 0x4d6   : > { %2396 = vmatpush3.bf16.msra.mxu0 %v1250_v43  ;;  %2397 = vmatprep.mubr.msk.bf16.mxu0 %vm2711_vm1, %v2710_v17 }
 0x4d7   : > { %2407 = vmatprep.subr.bf16.mxu0 %v2710_v17 }
 0x4da   : > { %v2595_v45 = vpop.eup %2594 }
 0x4db   : > { %v1354_v47 = vmul.f32 %v2595_v45, %v2587_v26  ;;  %v2580_v45 = vld [vmem:[%s2984_s1 + $0x8] sm:$0xff]  }
 0x4dd   : > { %2398 = vmatmul.mubr.msk.bf16.vlgmr.msra.gmra.mxu0 %vm1064_vm3, %v1243_v44  ;;  %v1355_v51 = vpack.c.bf16 %v1354_v47, %v1354_v47  ;;  %v2579_v44 = vld [vmem:[%s2984_s1 + $0x10] sm:$0xff]   ;;  %v2297_v47 = vld [vmem:[%s3345_s18] ss:$0 sm:$0xff] }
 0x4de   : > { %2409 = vmatprep.mubr.msk.bf16.mxu0 %vm2711_vm1, %v2710_v17 }
 0x4f9   : > { %v1464_v46 = vpop.xlane.xlu1 %1463 }
 0x4fa   : > { %2596 = vrcp.f32 %v1464_v46  ;;  %v2581_v46 = vld [vmem:[%s2984_s1] sm:$0xff]  }
 0x4fd   : > { %v1357_v48 = vpop.permute.xlu1 %1356 }
 0x4fe   : > { %v1362_v49 = vsel %vm1136_vm4, %v1357_v48, 0 }
 0x4ff   : > { %2408 = vmatpush3.bf16.msra.mxu0 %v1362_v49 }
 0x500   : > { %2419 = vmatprep.subr.bf16.mxu0 %v2710_v17 }
 0x502   : > { %2410 = vmatmul.mubr.msk.bf16.vlgmr.msra.gmra.mxu0 %vm1064_vm3, %v1355_v51 }
 0x503   : > { %2420 = vmatpush3.bf16.msra.mxu0 %v1474_v52  ;;  %2421 = vmatprep.mubr.msk.bf16.mxu0 %vm2711_vm1, %v2710_v17 }
 0x504   : > { %2433 = vmatprep.subr.bf16.mxu0 %v2710_v17 }
 0x507   : > { %v2597_v53 = vpop.eup %2596 }
 0x508   : > { %v1466_v54 = vmul.f32 %v2597_v53, %v2589_v31 }
 0x50a   : > { %v1467_v55 = vpack.c.bf16 %v1466_v54, %v1466_v54 }
 0x50c   : > { %2422 = vmatmul.mubr.msk.bf16.vlgmr.msra.gmra.mxu0 %vm1064_vm3, %v1467_v55 }
 0x50d   : > { %2437 = vmatprep.mubr.msk.bf16.mxu0 %vm2711_vm1, %v2710_v17  ;;  %2434 = vmatpush3.bf16.msra.mxu0 %v2576_v33 }
 0x50e   : > { %2435 = vmatprep.subr.bf16.mxu0 %v2710_v17 }
 0x511   : > { %2436 = vmatpush3.bf16.msra.mxu0 %v2577_v34 }
 0x595   : > { %v1174_v56 = vpop.f32.mrf.mxu0 }
 0x597   : > { %v2387_v57 = vpop.f32.mrf.mxu0 }
 0x599   : > { %v1177_v58 = vpop.f32.mrf.mxu0 }
 0x59b   : > { %v2388_v59 = vpop.f32.mrf.mxu0 }
 0x59d   : > { %v1286_v60 = vpop.f32.mrf.mxu0 }
 0x59e   : > { %1517 = vrot.lane.b32.xlu1 %v1286_v60, %s2723_s22 }
 0x59f   : > { %v2399_v61 = vpop.f32.mrf.mxu0 }
 0x5a1   : > { %v1289_v62 = vpop.f32.mrf.mxu0 }
 0x5a2   : > { %v2301_v62 = vld [vmem:[%s943_s27] ss:$0 sm:$0xff] }
 0x5a3   : > { %v2400_v63 = vpop.f32.mrf.mxu0 }
 0x5c2   : > { %v1398_v2 = vpop.f32.mrf.mxu0 }
 0x5c3   : > { %1521 = vrot.lane.b32.xlu0 %v1398_v2, %s2724_s20 }
 0x5c4   : > { %v2411_v3 = vpop.f32.mrf.mxu0 }
 0x5c6   : > { %v1401_v4 = vpop.f32.mrf.mxu0 }
 0x5c8   : > { %v2412_v5 = vpop.f32.mrf.mxu0 }
 0x5cc   : > { %v1510_v6 = vpop.f32.mrf.mxu0 }
 0x5cd   : > { %1525 = vrot.lane.b32.xlu1 %v1510_v6, %s2725_s29  ;;  %s3346_s29 = sld [smem:[#allocation8_spill]] }
 0x5ce   : > { %v2423_v7 = vpop.f32.mrf.mxu0 }
 0x5d0   : > { %v1513_v8 = vpop.f32.mrf.mxu0 }
 0x5d2   : > { %v2424_v9 = vpop.f32.mrf.mxu0 }
 0x5d3   : > { %p2309_p1 = scmp.ne.s32.totalorder %s3346_s29, 1 }
 0x5d4   : > { %s3347_s25 = sld [smem:[#allocation29_spill]] (!%p2309_p1) }
 0x5d5   : > { %s3348_s5 = sld [smem:[#allocation30_spill]] (!%p2309_p1) }
 0x5d6   : > { %s3349_s23 = sld [smem:[#allocation33_spill]] (!%p2309_p1) }
 0x5d7   : > { %s3350_s1 = sld [smem:[#allocation35_spill]] (!%p2309_p1) }
 0x5d8   : > { %s3351_s7 = sld [smem:[#allocation31_spill]] (!%p2309_p1) }
 0x5d9   : > { %s3352_s3 = sld [smem:[#allocation32_spill]] (!%p2309_p1) }
 0x5da   : > { %s3353_s6 = sld [smem:[#allocation34_spill]] (!%p2309_p1) }
 0x5db   : > { %s3354_s24 = sld [smem:[#allocation36_spill]] (!%p2309_p1) }
 0x610   : > { %v1518_v10 = vpop.permute.xlu1 %1517 }
 0x611   : > { %v1528_v12 = vsel %vm1064_vm3, %v1174_v56, %v1518_v10 }
 0x635   : > { %v1522_v11 = vpop.permute.xlu0 %1521 }
 0x636   : > { %v1530_v13 = vsel %vm1529_vm5, %v1528_v12, %v1522_v11 }
 0x63f   : > { %v1526_v14 = vpop.permute.xlu1 %1525 }
 0x640   : > { %v1532_v15 = vsel %vm1531_vm6, %v1530_v13, %v1526_v14 }
 0x641   : > { %v1533_v16 = vpack.c.bf16 %v1532_v15, %v1532_v15  ;;  %v2307_v15 = vld [vmem:[%s946_s21] ss:$0 sm:$0xff] }
 0x643   : > { %2430 = vmatmul.mubr.msk.bf16.vlgmr.msra.gmra.mxu1 %vm1016_vm2, %v1533_v16 }
 0x644   : > { %2449 = vmatprep.mubr.msk.bf16.mxu1 %vm2711_vm1, %v2710_v17  ;;  %2442 = vmatpush3.bf16.msra.mxu1 %v2578_v25 }
 0x645   : > { %2443 = vmatprep.subr.bf16.mxu1 %v2710_v17 }
 0x648   : > { %2444 = vmatpush3.bf16.msra.mxu1 %v2579_v44 }
 0x649   : > { %2445 = vmatprep.subr.bf16.mxu1 %v2710_v17 }
 0x64c   : > { %2446 = vmatpush3.bf16.msra.mxu1 %v2580_v45 }
 0x64d   : > { %2447 = vmatprep.subr.bf16.mxu1 %v2710_v17 }
 0x650   : > { %2448 = vmatpush3.bf16.msra.mxu1 %v2581_v46 }
 0x703   : > { %v1594_v20 = vpop.f32.mrf.mxu1 }
 0x704   : > { %v1595_v21 = vadd.f32 %v2291_v18, %v1594_v20  ;;  %v2308_v18 = vld [vmem:[%s949_s8] ss:$0 sm:$0xff] }
 0x705   : > { %v2431_v22 = vpop.f32.mrf.mxu1 }
 0x706   : > { %v1600_v23 = vadd.f32 %v1595_v21, %v3014_v19 }
 0x707   : > { %v1597_v24 = vpop.f32.mrf.mxu1 }
 0x708   : > { %v1603_v26 = vsel %vm1016_vm2, %v1600_v23, 0.0 }
 0x709   : > { %1604 = vadd.xlane.f32.xlu0 %v1603_v26  ;;  %v2432_v27 = vpop.f32.mrf.mxu1 }
 0x792   : > { %v1605_v28 = vpop.xlane.xlu0 %1604 }
 0x793   : > { %v1607_v29 = vmul.f32 0.03125, %v1605_v28 }
 0x795   : > { %v1608_v30 = vsub.f32 %v1600_v23, %v1607_v29 }
 0x797   : > { %v1609_v31 = vmul.f32 %v1608_v30, %v1608_v30 }
 0x799   : > { %v1610_v32 = vsel %vm1016_vm2, %v1609_v31, 0.0 }
 0x79a   : > { %1611 = vadd.xlane.f32.xlu1 %v1610_v32 }
 0x823   : > { %v1612_v19 = vpop.xlane.xlu1 %1611 }
 0x824   : > { %v1613_v35 = vmul.f32 0.03125, %v1612_v19 }
 0x826   : > { %v1614_v36 = vadd.f32 1e-05, %v1613_v35 }
 0x828   : > { %2598 = vrsqrt.f32 %v1614_v36 }
 0x835   : > { %v2599_v37 = vpop.eup %2598 }
 0x836   : > { %v1616_v39 = vmul.f32 %v2599_v37, %v1608_v30 }
 0x838   : > { %v1623_v41 = vmul.f32 %v2295_v38, %v1616_v39 }
 0x83a   : > { %v1630_v42 = vadd.f32 %v2296_v40, %v1623_v41 }
 0x83c   : > { %v1631_v43 = vpack.c.bf16 %v1630_v42, %v1630_v42 }
 0x83e   : > { %2438 = vmatmul.mubr.msk.bf16.vlgmr.msra.gmra.mxu0 %vm1016_vm2, %v1631_v43 }
 0x8fe   : > { %v1692_v48 = vpop.f32.mrf.mxu0 }
 0x8ff   : > { %v1693_v49 = vadd.f32 %v2297_v47, %v1692_v48 }
 0x900   : > { %v2439_v50 = vpop.f32.mrf.mxu0 }
 0x901   : > { %v1698_v51 = vmul.f32 %v1693_v49, %v1693_v49 }
 0x902   : > { %v1695_v52 = vpop.f32.mrf.mxu0 }
 0x903   : > { %v1699_v53 = vmul.f32 %v1698_v51, %v1693_v49 }
 0x904   : > { %v2440_v54 = vpop.f32.mrf.mxu0 }
 0x905   : > { %v1700_v55 = vmul.f32 0.044715, %v1699_v53 }
 0x907   : > { %v1701_v56 = vadd.f32 %v1700_v55, %v1693_v49 }
 0x909   : > { %v1702_v57 = vmul.f32 0.7978846, %v1701_v56 }
 0x90b   : > { %2600 = vtanh.f32 %v1702_v57 }
 0x918   : > { %v2601_v17 = vpop.eup %2600 }
 0x919   : > { %v1704_v58 = vadd.f32 1.0, %v2601_v17 }
 0x91b   : > { %v1705_v59 = vmul.f32 0.5, %v1704_v58 }
 0x91d   : > { %v1706_v60 = vmul.f32 %v1705_v59, %v1693_v49 }
 0x91f   : > { %v1707_v61 = vpack.c.bf16 %v1706_v60, %v1706_v60 }
 0x921   : > { %2450 = vmatmul.mubr.msk.bf16.vlgmr.msra.gmra.mxu1 %vm1747_vm7, %v1707_v61 }
 0x9e1   : > { %v1785_v63 = vpop.f32.mrf.mxu1 }
 0x9e2   : > { %v1786_v0 = vadd.f32 %v2301_v62, %v1785_v63 }
 0x9e3   : > { %v2451_v1 = vpop.f32.mrf.mxu1 }
 0x9e4   : > { %v1791_v2 = vadd.f32 %v1786_v0, %v1630_v42 }
 0x9e5   : > { %v1788_v3 = vpop.f32.mrf.mxu1 }
 0x9e6   : > { %v1794_v4 = vsel %vm1016_vm2, %v1791_v2, 0.0 }
 0x9e7   : > { %1795 = vadd.xlane.f32.xlu0 %v1794_v4  ;;  %v2452_v5 = vpop.f32.mrf.mxu1 }
 0xa70   : > { %v1796_v6 = vpop.xlane.xlu0 %1795 }
 0xa71   : > { %v1797_v7 = vmul.f32 0.03125, %v1796_v6 }
 0xa73   : > { %v1798_v8 = vsub.f32 %v1791_v2, %v1797_v7 }
 0xa75   : > { %v1799_v9 = vmul.f32 %v1798_v8, %v1798_v8 }
 0xa77   : > { %v1800_v10 = vsel %vm1016_vm2, %v1799_v9, 0.0 }
 0xa78   : > { %1801 = vadd.xlane.f32.xlu0 %v1800_v10 }
 0xb01   : > { %v1802_v11 = vpop.xlane.xlu0 %1801 }
 0xb02   : > { %v1803_v12 = vmul.f32 0.03125, %v1802_v11 }
 0xb04   : > { %v1804_v13 = vadd.f32 1e-05, %v1803_v12 }
 0xb06   : > { %2602 = vrsqrt.f32 %v1804_v13 }
 0xb13   : > { %v2603_v14 = vpop.eup %2602 }
 0xb14   : > { %v1806_v16 = vmul.f32 %v2603_v14, %v1798_v8 }
 0xb16   : > { %v1813_v20 = vmul.f32 %v2307_v15, %v1806_v16  ;;  %1825 = sbr.rel (%p2309_p1) target bundleno = 3783 (0xec7), region = 124 }
 0xb18   : > { %v1820_v21 = vadd.f32 %v2308_v18, %v1813_v20 }
 0xb1a   : > { %1821 = vst.msk [vmem:[#allocation2] sm:$0xff] %vm1016_vm2, %v1820_v21 }
 0xb1b   : > { %v2604_v22 = vld [vmem:[%s3347_s25 + $0x8] sm:$0xff]   ;;  %v2726_v23 = vmov 0.0   ;;  %v2605_v24 = vld [vmem:[%s3347_s25] sm:$0xff]   ;;  %vm2727_vm8 = vmmov 0   ;;  %v1826_v26 = vpack.c.bf16 %v1820_v21, %v1820_v21  ;;  %vm1898_vm9 = vcmask 253952   ;;  %v2608_v48 = vld [vmem:[%s3350_s1 + $0x18] sm:$0xff]  }
 0xb1c   : > { %2453 = vmatprep.subr.bf16.mxu1 %v2726_v23  ;;  %2469 = vmatprep.subr.bf16.mxu0 %v2726_v23  ;;  %v1831_v27 = vld [vmem:[%s3348_s5] sm:$0x1]  ;;  %v2606_v46 = vld [vmem:[%s3349_s23 + $0x8] sm:$0xff]   ;;  %v2609_v49 = vld [vmem:[%s3350_s1 + $0x10] sm:$0xff]   ;;  %vm2052_vm10 = vcmask 122880  }
 0xb1d   : > { %2454 = vmatpush3.bf16.msra.mxu1 %v2604_v22  ;;  %2457 = vmatprep.mubr.msk.bf16.mxu1 %vm2727_vm8, %v2726_v23  ;;  %v2607_v47 = vld [vmem:[%s3349_s23] sm:$0xff]   ;;  %v2610_v50 = vld [vmem:[%s3350_s1 + $0x8] sm:$0xff]  }
 0xb1e   : > { %2455 = vmatprep.subr.bf16.mxu1 %v2726_v23  ;;  %2477 = vmatprep.mubr.msk.bf16.mxu0 %vm2727_vm8, %v2726_v23  ;;  %v1896_v55 = vld [vmem:[%s3351_s7] sm:$0x1] }
 0xb1f   : > { %2470 = vmatpush3.bf16.msra.mxu0 %v2608_v48  ;;  %v1897_v57 = vld [vmem:[%s3352_s3] sm:$0x1] }
 0xb20   : > { %2471 = vmatprep.subr.bf16.mxu0 %v2726_v23  ;;  %v2611_v60 = vld [vmem:[%s3350_s1] sm:$0xff]  }
 0xb21   : > { %2456 = vmatpush3.bf16.msra.mxu1 %v2605_v24  ;;  %v1919_v61 = vld [vmem:[%s3353_s6] sm:$0x1] }
 0xb22   : > { %2461 = vmatprep.subr.bf16.mxu1 %v2726_v23  ;;  %v1984_v4 = vld [vmem:[%s3354_s24] sm:$0x1] }
 0xb23   : > { %2472 = vmatpush3.bf16.msra.mxu0 %v2609_v49 }
 0xb24   : > { %2458 = vmatmul.mubr.msk.bf16.vlgmr.msra.gmra.mxu1 %vm1016_vm2, %v1826_v26  ;;  %2473 = vmatprep.subr.bf16.mxu0 %v2726_v23 }
 0xb25   : > { %2465 = vmatprep.mubr.msk.bf16.mxu1 %vm2727_vm8, %v2726_v23  ;;  %2462 = vmatpush3.bf16.msra.mxu1 %v2606_v46 }
 0xb26   : > { %2463 = vmatprep.subr.bf16.mxu1 %v2726_v23 }
 0xb27   : > { %2474 = vmatpush3.bf16.msra.mxu0 %v2610_v50 }
 0xb28   : > { %2475 = vmatprep.subr.bf16.mxu0 %v2726_v23 }
 0xb29   : > { %2464 = vmatpush3.bf16.msra.mxu1 %v2607_v47 }
 0xb2b   : > { %2476 = vmatpush3.bf16.msra.mxu0 %v2611_v60 }
 0xbe4   : > { %v1881_v28 = vpop.f32.mrf.mxu1 }
 0xbe5   : > { %v1882_v29 = vadd.f32 %v1881_v28, %v1831_v27 }
 0xbe6   : > { %v2459_v30 = vpop.f32.mrf.mxu1 }
 0xbe7   : > { %v1887_v31 = vmul.f32 %v1882_v29, %v1882_v29 }
 0xbe8   : > { %v1884_v32 = vpop.f32.mrf.mxu1 }
 0xbe9   : > { %v1888_v33 = vmul.f32 %v1887_v31, %v1882_v29 }
 0xbea   : > { %v2460_v34 = vpop.f32.mrf.mxu1 }
 0xbeb   : > { %v1889_v19 = vmul.f32 0.044715, %v1888_v33 }
 0xbed   : > { %v1890_v35 = vadd.f32 %v1889_v19, %v1882_v29 }
 0xbef   : > { %v1891_v36 = vmul.f32 0.7978846, %v1890_v35 }
 0xbf1   : > { %2612 = vtanh.f32 %v1891_v36 }
 0xbfe   : > { %v2613_v37 = vpop.eup %2612 }
 0xbff   : > { %v1893_v38 = vadd.f32 1.0, %v2613_v37 }
 0xc01   : > { %v1894_v39 = vmul.f32 0.5, %v1893_v38 }
 0xc03   : > { %v1895_v40 = vmul.f32 %v1894_v39, %v1882_v29 }
 0xc05   : > { %v1899_v41 = vsel %vm1898_vm9, %v1895_v40, 0.0 }
 0xc06   : > { %1900 = vadd.xlane.f32.xlu0 %v1899_v41 }
 0xc8f   : > { %v1901_v42 = vpop.xlane.xlu0 %1900 }
 0xc90   : > { %v1902_v43 = vmul.f32 0.03125, %v1901_v42 }
 0xc92   : > { %v1903_v25 = vsub.f32 %v1895_v40, %v1902_v43 }
 0xc94   : > { %v1904_v44 = vmul.f32 %v1903_v25, %v1903_v25 }
 0xc96   : > { %v1905_v45 = vsel %vm1898_vm9, %v1904_v44, 0.0 }
 0xc97   : > { %1906 = vadd.xlane.f32.xlu0 %v1905_v45 }
 0xd20   : > { %v1907_v51 = vpop.xlane.xlu0 %1906 }
 0xd21   : > { %v1908_v52 = vmul.f32 0.03125, %v1907_v51 }
 0xd23   : > { %v1909_v53 = vadd.f32 1e-05, %v1908_v52 }
 0xd25   : > { %2614 = vrsqrt.f32 %v1909_v53 }
 0xd32   : > { %v2615_v54 = vpop.eup %2614 }
 0xd33   : > { %v1911_v56 = vmul.f32 %v2615_v54, %v1903_v25 }
 0xd35   : > { %v1912_v17 = vmul.f32 %v1911_v56, %v1896_v55 }
 0xd37   : > { %v1913_v58 = vadd.f32 %v1912_v17, %v1897_v57 }
 0xd39   : > { %v1914_v59 = vpack.c.bf16 %v1913_v58, %v1913_v58 }
 0xd3b   : > { %2466 = vmatmul.mubr.msk.bf16.vlgmr.msra.gmra.mxu1 %vm1016_vm2, %v1914_v59 }
 0xdfb   : > { %v1969_v62 = vpop.f32.mrf.mxu1 }
 0xdfc   : > { %v1970_v63 = vadd.f32 %v1969_v62, %v1919_v61 }
 0xdfd   : > { %v2467_v0 = vpop.f32.mrf.mxu1 }
 0xdfe   : > { %v1975_v1 = vpack.c.bf16 %v1970_v63, %v1970_v63 }
 0xdff   : > { %v1972_v2 = vpop.f32.mrf.mxu1 }
 0xe00   : > { %2478 = vmatmul.mubr.msk.bf16.vlgmr.msra.gmra.mxu0 %vm1747_vm7, %v1975_v1 }
 0xe01   : > { %v2468_v3 = vpop.f32.mrf.mxu1 }
 0xec0   : > { %v2046_v5 = vpop.f32.mrf.mxu0 }
 0xec1   : > { %v2047_v6 = vadd.f32 %v2046_v5, %v1984_v4 }
 0xec2   : > { %v2479_v7 = vpop.f32.mrf.mxu0 }
 0xec3   : > { %2053 = vst.msk [vmem:[%s2996_s17] sm:$0x1] %vm2052_vm10, %v2047_v6 }
 0xec4   : > { %v2049_v8 = vpop.f32.mrf.mxu0 }
 0xec6   : > { %v2480_v9 = vpop.f32.mrf.mxu0 }
 0xec7 PF: > { %s3355_s18 = sld [smem:[#allocation9_spill]]  ;;  %s2067_s7 = sshll.u32 %s2996_s17, 4  ;;  %s2068_s7 = int_to_ptr.vmem [resolvable:$true] %s2067_s7 }
 0xec8   : > { %s3357_s20 = sld [smem:[#allocation37_spill]]  ;;  %s3358_s0 = sand.u32 1, %s2684_s26  }
 0xec9   : > { %s2055_s21 = scalar_lea.sflag [#allocation4], %s3358_s0  ;;  %s2616_s3 = scalar_lea.vmem %s2068_s7, 16 }
 0xeca   : > { %p2617_p2 = scmp.ne.s32.totalorder %s2068_s7, %s2616_s3  ;;  %s2728_s4 = smov [#allocation3]  }
 0xecb   : > { %s2620_s8 = sshll.u32 %s2728_s4, 4  ;;  %s2621_s8 = int_to_ptr.vmem [resolvable:$false] %s2620_s8 }
 0xecc   : > { %p2618_p4 = pnand %p2617_p2, %p2903_p3  ;;  %s2622_s5 = scalar_lea.vmem %s2621_s8, 32 }
 0xecd   : > { %s2321_s27 = sshll.u32 %s3355_s18, 4  ;;  %p2623_p6 = scmp.lt.s32.totalorder %s2068_s7, %s2621_s8 }
 0xece   : > { %s2065_s29 = scalar_lea.hbm %s3357_s20, %s2321_s27  ;;  %p2619_p5 = pneg %p2618_p4 }
 0xecf   : > { %p2624_p7 = scmp.lt.s32.totalorder %s2622_s5, %s2616_s3 }
 0xed1   : > { %p2625_p8 = por %p2624_p7, %p2623_p6 }
 0xed3   : > { %p2626_p10 = pnand %p2625_p8, %p2619_p5 }
 0xed5   : > { %2629 = shalt.err (!%p2626_p10)
}
 0xed6   : > { %s2630_s2 = scalar_lea.hbm %s2065_s29, 16  ;;  %s2634_s19 = scalar_lea.hbm %s3357_s20, 32 }
 0xed7   : > { %p2631_p11 = scmp.ne.s32.totalorder %s2065_s29, %s2630_s2  ;;  %p2635_p0 = scmp.lt.s32.totalorder %s2065_s29, %s3357_s20 }
 0xed8   : > { %p2636_p1 = scmp.lt.s32.totalorder %s2634_s19, %s2630_s2 }
 0xed9   : > { %p2632_p12 = pnand %p2631_p11, %p2903_p3 }
 0xeda   : > { %p2637_p2 = por %p2636_p1, %p2635_p0 }
 0xedb   : > { %p2633_p13 = pneg %p2632_p12 }
 0xedd   : > { %p2638_p4 = pnand %p2637_p2, %p2633_p13 }
 0xedf   : > { %2641 = shalt.err (!%p2638_p4)
}
 0xee0   : > { %2481 = dma.vmem_to_hbm [thread:$0]  (%p2903_p3), %s2068_s7, 16, %s2065_s29, %s2055_s21  }
 0xee1 PF: > { %s3359_s18 = sld [smem:[#allocation12_spill]] }
 0xee2   : > { %s3360_s27 = sld [smem:[#allocation6_spill]] }
 0xee7   : > { %p2487_p5 = scmp.ge.s32.totalorder %s3359_s18, 2 }
 0xee8   : > { %s2079_s22 = sand.u32 1, %s3360_s27  }
 0xee9   : > { %p2484_p6 = pnand %p2487_p5, %p2913_p9  ;;  %s2080_s0 = scalar_lea.sflag [#allocation4], %s2079_s22 }
 0xeeb   : > { %p2485_p7 = pneg %p2484_p6 }
 0xeed   : > { %2675 = dma.done.wait (%p2485_p7), %s2080_s0, 16  }
 0xeee   : > { %2677 = vsyncadd (%p2485_p7), %s2080_s0, 4294967280  ;;  %s37_s0 = sadd.s32 1, %s3359_s18   ;;  %s3362_s3 = sld [smem:[#allocation7_spill]] }
 0xeef   : > { %p34_p8 = scmp.ge.s32.totalorder %s37_s0, 6   ;;  %s3363_s27 = sld [smem:[#allocation17_spill]] }
 0xef0   : > { %s3364_s28 = sld [smem:[#allocation10_spill]]  ;;  %s3368_s5 = smov %s2684_s26 }
 0xef1   : > { %s3365_s6 = sld [smem:[#allocation11_spill]]  ;;  %36 = sbr.rel (!%p34_p8) target bundleno = 24 (0x18), region = 198 }
 0xef2   : > { %s3366_s2 = sld [smem:[#allocation13_spill]] }
 0xef3   : > { %s3367_s29 = sld [smem:[#allocation15_spill]] }
 0xef4   : > { %s3369_s26 = smov %s3362_s3 }
 0xef6   :  { %2084 = vsyncpa [#allocation4], 1 }
 0xef7   :  { %2086 = vsyncpa [#allocation4 + $0x1], 1 }

</bundles_post_ra>
